<compile_context>
chip_gen: v6e
topology: v6e:2x2x1
jax: 0.10.0
libtpu: 0.0.40
codegen_flags: <defaults>
</compile_context>

<pallas_src>
import functools
import math

import jax
import jax.numpy as jnp
from jax import lax
from jax.experimental import pallas as pl
from jax.experimental.pallas import tpu as pltpu

_LN_EPS = 1e-5          # torch.nn.LayerNorm default
_NEG_INF = -1e9         # masked_fill value used by the reference module


def _round_up(x, m):
    return ((x + m - 1) // m) * m


# ----------------------------------------------------------------------------
# FeedForward: out = relu(x @ W1 + b1) [dropout] @ W2 + b2
# ----------------------------------------------------------------------------

def _ffn_kernel(seed_ref, x_ref, w1_ref, b1_ref, w2_ref, b2_ref, o_ref, *,
                dropout_rate, training):
    # --- linear1 (MXU, bf16 in / f32 acc) + bias + ReLU (VPU, f32) ---
    h = jnp.dot(x_ref[...], w1_ref[...], preferred_element_type=jnp.float32)
    h = h + b1_ref[...]
    h = jnp.maximum(h, 0.0)

    # --- dropout (training only; eval mode is identity and compiles away) ---
    # TODO(synk): training-mode mask uses the TPU hardware PRNG, so it is
    #             deterministic per seed but not bit-identical to torch's RNG.
    if training and dropout_rate > 0.0:
        pltpu.prng_seed(seed_ref[0], pl.program_id(0))   # per-tile stream
        bits = pltpu.bitcast(pltpu.prng_random_bits(h.shape), jnp.uint32)
        thresh = jnp.uint32(min(int(dropout_rate * (2 ** 32)), 2 ** 32 - 1))
        inv_keep = 1.0 / (1.0 - dropout_rate)
        h = jnp.where(bits >= thresh, h * inv_keep, 0.0)

    # --- linear2 (MXU, bf16 in / f32 acc) + bias ---
    h = h.astype(jnp.bfloat16)
    out = jnp.dot(h, w2_ref[...], preferred_element_type=jnp.float32)
    out = out + b2_ref[...]
    o_ref[...] = out.astype(o_ref.dtype)


def _choose_row_tile(m, d_in, d_out, bytes_budget=24 * 1024 * 1024):
    """Largest row tile (multiple of 8, <= 512) whose working set fits budget."""
    m8 = _round_up(max(m, 1), 8)
    # resident weights (bf16), assume double-buffered, plus biases (f32)
    wbytes = 2 * 2 * (d_in * d_out + d_out * d_in) + 2 * 4 * (d_in + d_out)
    for tm in (512, 256, 128, 64, 32, 16, 8):
        if tm > m8:
            continue
        act = (2 * tm * d_in * 2          # x blocks (bf16, double buffered)
               + 2 * tm * d_in * 4        # out blocks (f32, double buffered)
               + 3 * tm * d_out * 4)      # h intermediate + headroom
        if wbytes + act <= bytes_budget:
            return tm
    return 8


def feed_forward(x, w1, b1, w2, b2, *, dropout_rate=0.1, training=False,
                 seed=0):
    """x: (batch, seq, d_model).  W1: (d_model, d_ff), W2: (d_ff, d_model)."""
    batch, seq, d_model = x.shape
    d_ff = w1.shape[1]
    m = batch * seq

    dp = _round_up(d_model, 128)          # lane-dense feature dims (zero pad)
    fp = _round_up(d_ff, 128)
    tm = _choose_row_tile(m, dp, fp)
    m_pad = _round_up(m, tm)

    x2 = jnp.pad(x.reshape(m, d_model),
                 ((0, m_pad - m), (0, dp - d_model))).astype(jnp.bfloat16)
    w1p = jnp.pad(w1, ((0, dp - d_model), (0, fp - d_ff))).astype(jnp.bfloat16)
    w2p = jnp.pad(w2, ((0, fp - d_ff), (0, dp - d_model))).astype(jnp.bfloat16)
    b1p = jnp.pad(b1, (0, fp - d_ff)).reshape(1, fp).astype(jnp.float32)
    b2p = jnp.pad(b2, (0, dp - d_model)).reshape(1, dp).astype(jnp.float32)
    seed_arr = jnp.array([seed], dtype=jnp.int32)

    kernel = functools.partial(_ffn_kernel, dropout_rate=dropout_rate,
                               training=training)
    flops = 4 * m_pad * dp * fp           # two matmuls, 2*M*K*N each
    bytes_accessed = (x2.size * 2 + w1p.size * 2 + w2p.size * 2
                      + b1p.size * 4 + b2p.size * 4 + m_pad * dp * 4)

    out2d = pl.pallas_call(
        kernel,
        out_shape=jax.ShapeDtypeStruct((m_pad, dp), jnp.float32),
        grid_spec=pltpu.PrefetchScalarGridSpec(
            num_scalar_prefetch=1,                       # seed -> SMEM
            grid=(m_pad // tm,),
            in_specs=[
                pl.BlockSpec((tm, dp), lambda i, s: (i, 0)),     # x tile
                pl.BlockSpec((dp, fp), lambda i, s: (0, 0)),     # W1 resident
                pl.BlockSpec((1, fp), lambda i, s: (0, 0)),      # b1 resident
                pl.BlockSpec((fp, dp), lambda i, s: (0, 0)),     # W2 resident
                pl.BlockSpec((1, dp), lambda i, s: (0, 0)),      # b2 resident
            ],
            out_specs=pl.BlockSpec((tm, dp), lambda i, s: (i, 0)),
        ),
        compiler_params=pltpu.CompilerParams(
            dimension_semantics=("parallel",),
            vmem_limit_bytes=48 * 1024 * 1024),
        cost_estimate=pl.CostEstimate(flops=flops, transcendentals=0,
                                      bytes_accessed=bytes_accessed),
    )(seed_arr, x2, w1p, b1p, w2p, b2p)

    return out2d[:m, :d_model].reshape(batch, seq, d_model)


# ----------------------------------------------------------------------------
# Residual add + dropout + LayerNorm:  out = LN(x + dropout(y))
# ----------------------------------------------------------------------------

def _add_ln_kernel(seed_ref, x_ref, y_ref, g_ref, b_ref, o_ref, *,
                   dropout_rate, training, eps):
    y = y_ref[...].astype(jnp.float32)
    if training and dropout_rate > 0.0:
        pltpu.prng_seed(seed_ref[0], pl.program_id(0))
        bits = pltpu.bitcast(pltpu.prng_random_bits(y.shape), jnp.uint32)
        thresh = jnp.uint32(min(int(dropout_rate * (2 ** 32)), 2 ** 32 - 1))
        y = jnp.where(bits >= thresh, y * (1.0 / (1.0 - dropout_rate)), 0.0)
    z = x_ref[...].astype(jnp.float32) + y
    mu = jnp.mean(z, axis=-1, keepdims=True)
    zc = z - mu
    var = jnp.mean(zc * zc, axis=-1, keepdims=True)
    inv = lax.rsqrt(var + eps)
    o_ref[...] = (zc * inv * g_ref[...] + b_ref[...]).astype(o_ref.dtype)


def add_dropout_layernorm(x, y, gamma, beta, *, dropout_rate=0.1,
                          training=False, seed=0):
    batch, seq, d_model = x.shape
    m = batch * seq
    tm = min(512, _round_up(m, 8))
    m_pad = _round_up(m, tm)

    x2 = jnp.pad(x.reshape(m, d_model), ((0, m_pad - m), (0, 0)))
    y2 = jnp.pad(y.reshape(m, d_model), ((0, m_pad - m), (0, 0)))
    g2 = gamma.reshape(1, d_model).astype(jnp.float32)
    b2 = beta.reshape(1, d_model).astype(jnp.float32)
    seed_arr = jnp.array([seed], dtype=jnp.int32)

    kernel = functools.partial(_add_ln_kernel, dropout_rate=dropout_rate,
                               training=training, eps=_LN_EPS)
    out2d = pl.pallas_call(
        kernel,
        out_shape=jax.ShapeDtypeStruct((m_pad, d_model), jnp.float32),
        grid_spec=pltpu.PrefetchScalarGridSpec(
            num_scalar_prefetch=1,
            grid=(m_pad // tm,),
            in_specs=[
                pl.BlockSpec((tm, d_model), lambda i, s: (i, 0)),
                pl.BlockSpec((tm, d_model), lambda i, s: (i, 0)),
                pl.BlockSpec((1, d_model), lambda i, s: (0, 0)),
                pl.BlockSpec((1, d_model), lambda i, s: (0, 0)),
            ],
            out_specs=pl.BlockSpec((tm, d_model), lambda i, s: (i, 0)),
        ),
        compiler_params=pltpu.CompilerParams(
            dimension_semantics=("parallel",)),
    )(seed_arr, x2, y2, g2, b2)
    return out2d[:m].reshape(batch, seq, d_model)


def layer_norm(x, gamma, beta):
    return add_dropout_layernorm(x, jnp.zeros_like(x), gamma, beta,
                                 dropout_rate=0.0, training=False)


# ----------------------------------------------------------------------------
# Multi-head self-attention (one batch element per grid step)
# ----------------------------------------------------------------------------

def _mha_kernel(x_ref, mask_ref, wq_ref, bq_ref, wk_ref, bk_ref,
                wv_ref, bv_ref, wo_ref, bo_ref, o_ref, *, num_heads, d_k):
    x = x_ref[0].astype(jnp.bfloat16)             # (seq, d_model)
    mask = mask_ref[0]                            # (seq, seq): 1=attend, 0=mask
    scale = 1.0 / math.sqrt(d_k)
    acc = jnp.zeros(o_ref.shape[1:], jnp.float32)      # (seq, d_model)
    for h in range(num_heads):                    # static unroll over heads
        q = jnp.dot(x, wq_ref[h], preferred_element_type=jnp.float32) + bq_ref[h]
        k = jnp.dot(x, wk_ref[h], preferred_element_type=jnp.float32) + bk_ref[h]
        v = jnp.dot(x, wv_ref[h], preferred_element_type=jnp.float32) + bv_ref[h]
        # scores = q @ k^T (contract d_k of both sides; no explicit transpose)
        s = lax.dot_general(q.astype(jnp.bfloat16), k.astype(jnp.bfloat16),
                            (((1,), (1,)), ((), ())),
                            preferred_element_type=jnp.float32) * scale
        s = jnp.where(mask == 0.0, _NEG_INF, s)
        s = s - jnp.max(s, axis=-1, keepdims=True)
        e = jnp.exp(s)
        p = e / jnp.sum(e, axis=-1, keepdims=True)
        ctx = jnp.dot(p.astype(jnp.bfloat16), v.astype(jnp.bfloat16),
                      preferred_element_type=jnp.float32)        # (seq, d_k)
        # per-head output projection, summed  ==  concat(heads) @ Wo
        acc = acc + jnp.dot(ctx.astype(jnp.bfloat16), wo_ref[h],
                            preferred_element_type=jnp.float32)
    o_ref[0] = (acc + bo_ref[...]).astype(o_ref.dtype)


def multi_head_attention(x, mask, wq, bq, wk, bk, wv, bv, wo, bo, *, num_heads):
    batch, seq, d_model = x.shape
    assert d_model % num_heads == 0
    d_k = d_model // num_heads

    def split_cols(w):    # (d_model, d_model) -> (H, d_model, d_k): per-head cols
        return jnp.transpose(w.reshape(d_model, num_heads, d_k),
                             (1, 0, 2)).astype(jnp.bfloat16)

    def split_bias(b):    # (d_model,) -> (H, 1, d_k)
        return b.reshape(num_heads, 1, d_k).astype(jnp.float32)

    wq_h, wk_h, wv_h = split_cols(wq), split_cols(wk), split_cols(wv)
    wo_h = wo.reshape(num_heads, d_k, d_model).astype(jnp.bfloat16)  # per-head rows
    bq_h, bk_h, bv_h = split_bias(bq), split_bias(bk), split_bias(bv)
    bo_2d = bo.reshape(1, d_model).astype(jnp.float32)

    if mask is None:
        mask = jnp.ones((batch, seq, seq), jnp.float32)
    mask = mask.astype(jnp.float32)

    kernel = functools.partial(_mha_kernel, num_heads=num_heads, d_k=d_k)

    def full(shape):      # whole-array block, resident across grid steps
        return pl.BlockSpec(shape, lambda b, _n=len(shape): (0,) * _n)

    out = pl.pallas_call(
        kernel,
        out_shape=jax.ShapeDtypeStruct((batch, seq, d_model), jnp.float32),
        grid_spec=pltpu.PrefetchScalarGridSpec(
            num_scalar_prefetch=0,
            grid=(batch,),
            in_specs=[
                pl.BlockSpec((1, seq, d_model), lambda b: (b, 0, 0)),   # x
                pl.BlockSpec((1, seq, seq), lambda b: (b, 0, 0)),       # mask
                full((num_heads, d_model, d_k)),    # Wq (per head)
                full((num_heads, 1, d_k)),          # bq
                full((num_heads, d_model, d_k)),    # Wk
                full((num_heads, 1, d_k)),          # bk
                full((num_heads, d_model, d_k)),    # Wv
                full((num_heads, 1, d_k)),          # bv
                full((num_heads, d_k, d_model)),    # Wo (per head rows)
                full((1, d_model)),                 # bo
            ],
            out_specs=pl.BlockSpec((1, seq, d_model), lambda b: (b, 0, 0)),
        ),
        compiler_params=pltpu.CompilerParams(
            dimension_semantics=("parallel",)),
    )(x.astype(jnp.float32), mask, wq_h, bq_h, wk_h, bk_h, wv_h, bv_h,
      wo_h, bo_2d)
    return out


# ----------------------------------------------------------------------------
# Encoder: num_layers x (MHA -> Add&LN -> FFN -> Add&LN) -> final LN
# ----------------------------------------------------------------------------

def init_encoder_params(key, num_layers, d_model, num_heads, d_ff):
    def linear(k, fan_in, fan_out):
        kw, kb = jax.random.split(k)
        bound = 1.0 / math.sqrt(fan_in)
        w = jax.random.uniform(kw, (fan_in, fan_out), jnp.float32, -bound, bound)
        b = jax.random.uniform(kb, (fan_out,), jnp.float32, -bound, bound)
        return w, b

    params = []
    for lk in jax.random.split(key, num_layers):
        ks = jax.random.split(lk, 6)
        wq, bq = linear(ks[0], d_model, d_model)
        wk, bk = linear(ks[1], d_model, d_model)
        wv, bv = linear(ks[2], d_model, d_model)
        wo, bo = linear(ks[3], d_model, d_model)
        w1, b1 = linear(ks[4], d_model, d_ff)
        w2, b2 = linear(ks[5], d_ff, d_model)
        params.append(dict(
            wq=wq, bq=bq, wk=wk, bk=bk, wv=wv, bv=bv, wo=wo, bo=bo,
            g1=jnp.ones((d_model,), jnp.float32),
            be1=jnp.zeros((d_model,), jnp.float32),
            g2=jnp.ones((d_model,), jnp.float32),
            be2=jnp.zeros((d_model,), jnp.float32),
            w1=w1, b1=b1, w2=w2, b2=b2))
    final = dict(g=jnp.ones((d_model,), jnp.float32),
                 b=jnp.zeros((d_model,), jnp.float32))
    return params, final


def encoder_forward(src, src_mask, layer_params, final_norm, *, num_heads,
                    dropout_rate=0.1, training=False, seed=0):
    x = src.astype(jnp.float32)
    s = seed
    for p in layer_params:
        attn = multi_head_attention(x, src_mask, p['wq'], p['bq'], p['wk'],
                                    p['bk'], p['wv'], p['bv'], p['wo'],
                                    p['bo'], num_heads=num_heads)
        x = add_dropout_layernorm(x, attn, p['g1'], p['be1'],
                                  dropout_rate=dropout_rate,
                                  training=training, seed=s)
        s += 1
        ff = feed_forward(x, p['w1'], p['b1'], p['w2'], p['b2'],
                          dropout_rate=dropout_rate, training=training, seed=s)
        s += 1
        x = add_dropout_layernorm(x, ff, p['g2'], p['be2'],
                                  dropout_rate=dropout_rate,
                                  training=training, seed=s)
        s += 1
    return layer_norm(x, final_norm['g'], final_norm['b'])


# ----------------------------------------------------------------------------
# Pure-JAX reference (mirrors the kernel's bf16-at-MXU precision policy)
# ----------------------------------------------------------------------------

def _ref_encoder(src, mask, layer_params, final_norm, *, num_heads):
    bf16, f32 = jnp.bfloat16, jnp.float32

    def mm(a, b):
        return jnp.dot(a.astype(bf16), b.astype(bf16),
                       preferred_element_type=f32)

    def ln(z, g, b):
        mu = jnp.mean(z, -1, keepdims=True)
        zc = z - mu
        var = jnp.mean(zc * zc, -1, keepdims=True)
        return zc * lax.rsqrt(var + _LN_EPS) * g + b

    def mha(x, mask, p):
        B, S, D = x.shape
        dk = D // num_heads
        scale = 1.0 / math.sqrt(dk)
        outs = []
        for bi in range(B):
            xb = x[bi]
            acc = jnp.zeros((S, D), f32)
            for h in range(num_heads):
                cols = slice(h * dk, (h + 1) * dk)
                q = mm(xb, p['wq'][:, cols]) + p['bq'][cols]
                k = mm(xb, p['wk'][:, cols]) + p['bk'][cols]
                v = mm(xb, p['wv'][:, cols]) + p['bv'][cols]
                s = mm(q, k.T) * scale
                s = jnp.where(mask[bi] == 0.0, _NEG_INF, s)
                s = s - jnp.max(s, -1, keepdims=True)
                e = jnp.exp(s)
                pr = e / jnp.sum(e, -1, keepdims=True)
                ctx = mm(pr, v)
                acc = acc + mm(ctx, p['wo'][cols, :])
            outs.append(acc + p['bo'])
        return jnp.stack(outs)

    def ffn(x, p):
        h = mm(x, p['w1']) + p['b1']
        h = jnp.maximum(h, 0.0)
        return mm(h, p['w2']) + p['b2']

    x = src.astype(f32)
    for p in layer_params:
        x = ln(x + mha(x, mask, p), p['g1'], p['be1'])
        x = ln(x + ffn(x, p), p['g2'], p['be2'])
    return ln(x, final_norm['g'], final_norm['b'])


if __name__ == "__main__":
    num_layers, d_model, num_heads, d_ff = 2, 32, 4, 64
    batch, seq = 2, 8
    dropout = 0.1

    root = jax.random.PRNGKey(0)
    k_x, k_p = jax.random.split(root)
    src = jax.random.normal(k_x, (batch, seq, d_model), jnp.float32)

    # Padding mask: batch 0 attends to all 8 positions, batch 1 to the first 6.
    lengths = jnp.array([seq, seq - 2])
    key_valid = (jnp.arange(seq)[None, :] < lengths[:, None]).astype(jnp.float32)
    src_mask = jnp.broadcast_to(key_valid[:, None, :], (batch, seq, seq))

    layer_params, final_norm = init_encoder_params(k_p, num_layers, d_model,
                                                   num_heads, d_ff)

    # Eval mode (== model.eval(): all dropout layers are identity).
    out = encoder_forward(src, src_mask, layer_params, final_norm,
                          num_heads=num_heads, dropout_rate=dropout,
                          training=False)
    out = jax.block_until_ready(out)

    ref = _ref_encoder(src, src_mask, layer_params, final_norm,
                       num_heads=num_heads)
    assert out.shape == (batch, seq, d_model)
    assert bool(jnp.all(jnp.isfinite(out)))
    assert jnp.allclose(out, ref, atol=1e-2, rtol=1e-2), (
        f"mismatch vs reference, max abs diff "
        f"{float(jnp.max(jnp.abs(out - ref)))}")

    print("KERNEL_OK")
</pallas_src>

<mosaic_0001>
module attributes {stable_mosaic.version = 11 : i64} {
  func.func @_mha_kernel(%arg0: i32, %arg1: memref<1x8x32xf32, #tpu.memory_space<vmem>>, %arg2: memref<1x8x8xf32, #tpu.memory_space<vmem>>, %arg3: memref<4x32x8xbf16, #tpu.memory_space<vmem>>, %arg4: memref<4x1x8xf32, #tpu.memory_space<vmem>>, %arg5: memref<4x32x8xbf16, #tpu.memory_space<vmem>>, %arg6: memref<4x1x8xf32, #tpu.memory_space<vmem>>, %arg7: memref<4x32x8xbf16, #tpu.memory_space<vmem>>, %arg8: memref<4x1x8xf32, #tpu.memory_space<vmem>>, %arg9: memref<4x8x32xbf16, #tpu.memory_space<vmem>>, %arg10: memref<1x32xf32, #tpu.memory_space<vmem>>, %arg11: memref<1x8x32xf32, #tpu.memory_space<vmem>>) attributes {dimension_semantics = [#tpu.dimension_semantics<parallel>], iteration_bounds = array<i64: 2>, scalar_prefetch = 0 : i64, scratch_operands = 0 : i64, tpu.core_type = #tpu.core_type<tc>, window_params = [{transform_indices = @transform_0, window_bounds = array<i64: 1, 8, 32>}, {transform_indices = @transform_1, window_bounds = array<i64: 1, 8, 8>}, {pipeline_mode = #tpu.pipeline_mode<synchronous>, transform_indices = @transform_2, window_bounds = array<i64: 4, 32, 8>}, {pipeline_mode = #tpu.pipeline_mode<synchronous>, transform_indices = @transform_3, window_bounds = array<i64: 4, 1, 8>}, {pipeline_mode = #tpu.pipeline_mode<synchronous>, transform_indices = @transform_4, window_bounds = array<i64: 4, 32, 8>}, {pipeline_mode = #tpu.pipeline_mode<synchronous>, transform_indices = @transform_5, window_bounds = array<i64: 4, 1, 8>}, {pipeline_mode = #tpu.pipeline_mode<synchronous>, transform_indices = @transform_6, window_bounds = array<i64: 4, 32, 8>}, {pipeline_mode = #tpu.pipeline_mode<synchronous>, transform_indices = @transform_7, window_bounds = array<i64: 4, 1, 8>}, {pipeline_mode = #tpu.pipeline_mode<synchronous>, transform_indices = @transform_8, window_bounds = array<i64: 4, 8, 32>}, {pipeline_mode = #tpu.pipeline_mode<synchronous>, transform_indices = @transform_9, window_bounds = array<i64: 1, 32>}, {transform_indices = @transform_10, window_bounds = array<i64: 1, 8, 32>}]} {
    %c0 = arith.constant 0 : index
    %c0_0 = arith.constant 0 : index
    %c0_1 = arith.constant 0 : index
    %0 = vector.load %arg1[%c0, %c0_0, %c0_1] : memref<1x8x32xf32, #tpu.memory_space<vmem>>, vector<1x8x32xf32>
    %1 = vector.shape_cast %0 : vector<1x8x32xf32> to vector<8x32xf32>
    %2 = arith.truncf %1 : vector<8x32xf32> to vector<8x32xbf16>
    %c0_2 = arith.constant 0 : index
    %c0_3 = arith.constant 0 : index
    %c0_4 = arith.constant 0 : index
    %3 = vector.load %arg2[%c0_2, %c0_3, %c0_4] : memref<1x8x8xf32, #tpu.memory_space<vmem>>, vector<1x8x8xf32>
    %4 = vector.shape_cast %3 : vector<1x8x8xf32> to vector<8x8xf32>
    %cst = arith.constant 0.000000e+00 : f32
    %5 = vector.broadcast %cst : f32 to vector<8x32xf32>
    %c0_5 = arith.constant 0 : index
    %c0_6 = arith.constant 0 : index
    %c0_7 = arith.constant 0 : index
    %6 = vector.load %arg3[%c0_5, %c0_6, %c0_7] : memref<4x32x8xbf16, #tpu.memory_space<vmem>>, vector<1x32x8xbf16>
    %7 = vector.shape_cast %6 : vector<1x32x8xbf16> to vector<32x8xbf16>
    %cst_8 = arith.constant dense<0.000000e+00> : vector<8x8xf32>
    %8 = tpu.matmul %2, %7, %cst_8 {dimension_numbers = #tpu.dot_dimension_numbers<[1], [0], [0], [1], [0, 0, 1, 1], [], []>} : vector<8x32xbf16>, vector<32x8xbf16>, vector<8x8xf32> -> vector<8x8xf32>
    %c0_9 = arith.constant 0 : index
    %c0_10 = arith.constant 0 : index
    %c0_11 = arith.constant 0 : index
    %9 = vector.load %arg4[%c0_9, %c0_10, %c0_11] : memref<4x1x8xf32, #tpu.memory_space<vmem>>, vector<1x1x8xf32>
    %10 = vector.shape_cast %9 : vector<1x1x8xf32> to vector<1x8xf32>
    %11 = vector.broadcast %10 : vector<1x8xf32> to vector<8x8xf32>
    %12 = arith.addf %8, %11 : vector<8x8xf32>
    %c0_12 = arith.constant 0 : index
    %c0_13 = arith.constant 0 : index
    %c0_14 = arith.constant 0 : index
    %13 = vector.load %arg5[%c0_12, %c0_13, %c0_14] : memref<4x32x8xbf16, #tpu.memory_space<vmem>>, vector<1x32x8xbf16>
    %14 = vector.shape_cast %13 : vector<1x32x8xbf16> to vector<32x8xbf16>
    %cst_15 = arith.constant dense<0.000000e+00> : vector<8x8xf32>
    %15 = tpu.matmul %2, %14, %cst_15 {dimension_numbers = #tpu.dot_dimension_numbers<[1], [0], [0], [1], [0, 0, 1, 1], [], []>} : vector<8x32xbf16>, vector<32x8xbf16>, vector<8x8xf32> -> vector<8x8xf32>
    %c0_16 = arith.constant 0 : index
    %c0_17 = arith.constant 0 : index
    %c0_18 = arith.constant 0 : index
    %16 = vector.load %arg6[%c0_16, %c0_17, %c0_18] : memref<4x1x8xf32, #tpu.memory_space<vmem>>, vector<1x1x8xf32>
    %17 = vector.shape_cast %16 : vector<1x1x8xf32> to vector<1x8xf32>
    %18 = vector.broadcast %17 : vector<1x8xf32> to vector<8x8xf32>
    %19 = arith.addf %15, %18 : vector<8x8xf32>
    %c0_19 = arith.constant 0 : index
    %c0_20 = arith.constant 0 : index
    %c0_21 = arith.constant 0 : index
    %20 = vector.load %arg7[%c0_19, %c0_20, %c0_21] : memref<4x32x8xbf16, #tpu.memory_space<vmem>>, vector<1x32x8xbf16>
    %21 = vector.shape_cast %20 : vector<1x32x8xbf16> to vector<32x8xbf16>
    %cst_22 = arith.constant dense<0.000000e+00> : vector<8x8xf32>
    %22 = tpu.matmul %2, %21, %cst_22 {dimension_numbers = #tpu.dot_dimension_numbers<[1], [0], [0], [1], [0, 0, 1, 1], [], []>} : vector<8x32xbf16>, vector<32x8xbf16>, vector<8x8xf32> -> vector<8x8xf32>
    %c0_23 = arith.constant 0 : index
    %c0_24 = arith.constant 0 : index
    %c0_25 = arith.constant 0 : index
    %23 = vector.load %arg8[%c0_23, %c0_24, %c0_25] : memref<4x1x8xf32, #tpu.memory_space<vmem>>, vector<1x1x8xf32>
    %24 = vector.shape_cast %23 : vector<1x1x8xf32> to vector<1x8xf32>
    %25 = vector.broadcast %24 : vector<1x8xf32> to vector<8x8xf32>
    %26 = arith.addf %22, %25 : vector<8x8xf32>
    %27 = arith.truncf %12 : vector<8x8xf32> to vector<8x8xbf16>
    %28 = arith.truncf %19 : vector<8x8xf32> to vector<8x8xbf16>
    %cst_26 = arith.constant dense<0.000000e+00> : vector<8x8xf32>
    %29 = tpu.matmul %27, %28, %cst_26 {dimension_numbers = #tpu.dot_dimension_numbers<[1], [1], [0], [0], [0, 0, 1, 0], [], []>} : vector<8x8xbf16>, vector<8x8xbf16>, vector<8x8xf32> -> vector<8x8xf32>
    %cst_27 = arith.constant 0.353553385 : f32
    %30 = vector.broadcast %cst_27 : f32 to vector<8x8xf32>
    %31 = arith.mulf %29, %30 : vector<8x8xf32>
    %cst_28 = arith.constant 0.000000e+00 : f32
    %32 = vector.broadcast %cst_28 : f32 to vector<8x8xf32>
    %33 = arith.cmpf oeq, %4, %32 : vector<8x8xf32>
    %cst_29 = arith.constant -1.000000e+09 : f32
    %34 = vector.broadcast %cst_29 : f32 to vector<8x8xf32>
    %35 = arith.select %33, %34, %31 : vector<8x8xi1>, vector<8x8xf32>
    %cst_30 = arith.constant dense<0xFF800000> : vector<8xf32>
    %36 = vector.multi_reduction <maximumf>, %35, %cst_30 [1] : vector<8x8xf32> to vector<8xf32>
    %37 = vector.shape_cast %36 : vector<8xf32> to vector<8x1xf32>
    %38 = vector.broadcast %37 : vector<8x1xf32> to vector<8x8xf32>
    %39 = arith.subf %35, %38 : vector<8x8xf32>
    %40 = math.exp %39 : vector<8x8xf32>
    %cst_31 = arith.constant dense<0.000000e+00> : vector<8xf32>
    %41 = vector.multi_reduction <add>, %40, %cst_31 [1] : vector<8x8xf32> to vector<8xf32>
    %42 = vector.shape_cast %41 : vector<8xf32> to vector<8x1xf32>
    %43 = vector.broadcast %42 : vector<8x1xf32> to vector<8x8xf32>
    %44 = arith.divf %40, %43 : vector<8x8xf32>
    %45 = arith.truncf %44 : vector<8x8xf32> to vector<8x8xbf16>
    %46 = arith.truncf %26 : vector<8x8xf32> to vector<8x8xbf16>
    %cst_32 = arith.constant dense<0.000000e+00> : vector<8x8xf32>
    %47 = tpu.matmul %45, %46, %cst_32 {dimension_numbers = #tpu.dot_dimension_numbers<[1], [0], [0], [1], [0, 0, 1, 1], [], []>} : vector<8x8xbf16>, vector<8x8xbf16>, vector<8x8xf32> -> vector<8x8xf32>
    %48 = arith.truncf %47 : vector<8x8xf32> to vector<8x8xbf16>
    %c0_33 = arith.constant 0 : index
    %c0_34 = arith.constant 0 : index
    %c0_35 = arith.constant 0 : index
    %49 = vector.load %arg9[%c0_33, %c0_34, %c0_35] : memref<4x8x32xbf16, #tpu.memory_space<vmem>>, vector<1x8x32xbf16>
    %50 = vector.shape_cast %49 : vector<1x8x32xbf16> to vector<8x32xbf16>
    %cst_36 = arith.constant dense<0.000000e+00> : vector<8x32xf32>
    %51 = tpu.matmul %48, %50, %cst_36 {dimension_numbers = #tpu.dot_dimension_numbers<[1], [0], [0], [1], [0, 0, 1, 1], [], []>} : vector<8x8xbf16>, vector<8x32xbf16>, vector<8x32xf32> -> vector<8x32xf32>
    %52 = arith.addf %5, %51 : vector<8x32xf32>
    %c1 = arith.constant 1 : index
    %c0_37 = arith.constant 0 : index
    %c0_38 = arith.constant 0 : index
    %53 = vector.load %arg3[%c1, %c0_37, %c0_38] : memref<4x32x8xbf16, #tpu.memory_space<vmem>>, vector<1x32x8xbf16>
    %54 = vector.shape_cast %53 : vector<1x32x8xbf16> to vector<32x8xbf16>
    %cst_39 = arith.constant dense<0.000000e+00> : vector<8x8xf32>
    %55 = tpu.matmul %2, %54, %cst_39 {dimension_numbers = #tpu.dot_dimension_numbers<[1], [0], [0], [1], [0, 0, 1, 1], [], []>} : vector<8x32xbf16>, vector<32x8xbf16>, vector<8x8xf32> -> vector<8x8xf32>
    %c1_40 = arith.constant 1 : index
    %c0_41 = arith.constant 0 : index
    %c0_42 = arith.constant 0 : index
    %56 = vector.load %arg4[%c1_40, %c0_41, %c0_42] : memref<4x1x8xf32, #tpu.memory_space<vmem>>, vector<1x1x8xf32>
    %57 = vector.shape_cast %56 : vector<1x1x8xf32> to vector<1x8xf32>
    %58 = vector.broadcast %57 : vector<1x8xf32> to vector<8x8xf32>
    %59 = arith.addf %55, %58 : vector<8x8xf32>
    %c1_43 = arith.constant 1 : index
    %c0_44 = arith.constant 0 : index
    %c0_45 = arith.constant 0 : index
    %60 = vector.load %arg5[%c1_43, %c0_44, %c0_45] : memref<4x32x8xbf16, #tpu.memory_space<vmem>>, vector<1x32x8xbf16>
    %61 = vector.shape_cast %60 : vector<1x32x8xbf16> to vector<32x8xbf16>
    %cst_46 = arith.constant dense<0.000000e+00> : vector<8x8xf32>
    %62 = tpu.matmul %2, %61, %cst_46 {dimension_numbers = #tpu.dot_dimension_numbers<[1], [0], [0], [1], [0, 0, 1, 1], [], []>} : vector<8x32xbf16>, vector<32x8xbf16>, vector<8x8xf32> -> vector<8x8xf32>
    %c1_47 = arith.constant 1 : index
    %c0_48 = arith.constant 0 : index
    %c0_49 = arith.constant 0 : index
    %63 = vector.load %arg6[%c1_47, %c0_48, %c0_49] : memref<4x1x8xf32, #tpu.memory_space<vmem>>, vector<1x1x8xf32>
    %64 = vector.shape_cast %63 : vector<1x1x8xf32> to vector<1x8xf32>
    %65 = vector.broadcast %64 : vector<1x8xf32> to vector<8x8xf32>
    %66 = arith.addf %62, %65 : vector<8x8xf32>
    %c1_50 = arith.constant 1 : index
    %c0_51 = arith.constant 0 : index
    %c0_52 = arith.constant 0 : index
    %67 = vector.load %arg7[%c1_50, %c0_51, %c0_52] : memref<4x32x8xbf16, #tpu.memory_space<vmem>>, vector<1x32x8xbf16>
    %68 = vector.shape_cast %67 : vector<1x32x8xbf16> to vector<32x8xbf16>
    %cst_53 = arith.constant dense<0.000000e+00> : vector<8x8xf32>
    %69 = tpu.matmul %2, %68, %cst_53 {dimension_numbers = #tpu.dot_dimension_numbers<[1], [0], [0], [1], [0, 0, 1, 1], [], []>} : vector<8x32xbf16>, vector<32x8xbf16>, vector<8x8xf32> -> vector<8x8xf32>
    %c1_54 = arith.constant 1 : index
    %c0_55 = arith.constant 0 : index
    %c0_56 = arith.constant 0 : index
    %70 = vector.load %arg8[%c1_54, %c0_55, %c0_56] : memref<4x1x8xf32, #tpu.memory_space<vmem>>, vector<1x1x8xf32>
    %71 = vector.shape_cast %70 : vector<1x1x8xf32> to vector<1x8xf32>
    %72 = vector.broadcast %71 : vector<1x8xf32> to vector<8x8xf32>
    %73 = arith.addf %69, %72 : vector<8x8xf32>
    %74 = arith.truncf %59 : vector<8x8xf32> to vector<8x8xbf16>
    %75 = arith.truncf %66 : vector<8x8xf32> to vector<8x8xbf16>
    %cst_57 = arith.constant dense<0.000000e+00> : vector<8x8xf32>
    %76 = tpu.matmul %74, %75, %cst_57 {dimension_numbers = #tpu.dot_dimension_numbers<[1], [1], [0], [0], [0, 0, 1, 0], [], []>} : vector<8x8xbf16>, vector<8x8xbf16>, vector<8x8xf32> -> vector<8x8xf32>
    %cst_58 = arith.constant 0.353553385 : f32
    %77 = vector.broadcast %cst_58 : f32 to vector<8x8xf32>
    %78 = arith.mulf %76, %77 : vector<8x8xf32>
    %cst_59 = arith.constant 0.000000e+00 : f32
    %79 = vector.broadcast %cst_59 : f32 to vector<8x8xf32>
    %80 = arith.cmpf oeq, %4, %79 : vector<8x8xf32>
    %cst_60 = arith.constant -1.000000e+09 : f32
    %81 = vector.broadcast %cst_60 : f32 to vector<8x8xf32>
    %82 = arith.select %80, %81, %78 : vector<8x8xi1>, vector<8x8xf32>
    %cst_61 = arith.constant dense<0xFF800000> : vector<8xf32>
    %83 = vector.multi_reduction <maximumf>, %82, %cst_61 [1] : vector<8x8xf32> to vector<8xf32>
    %84 = vector.shape_cast %83 : vector<8xf32> to vector<8x1xf32>
    %85 = vector.broadcast %84 : vector<8x1xf32> to vector<8x8xf32>
    %86 = arith.subf %82, %85 : vector<8x8xf32>
    %87 = math.exp %86 : vector<8x8xf32>
    %cst_62 = arith.constant dense<0.000000e+00> : vector<8xf32>
    %88 = vector.multi_reduction <add>, %87, %cst_62 [1] : vector<8x8xf32> to vector<8xf32>
    %89 = vector.shape_cast %88 : vector<8xf32> to vector<8x1xf32>
    %90 = vector.broadcast %89 : vector<8x1xf32> to vector<8x8xf32>
    %91 = arith.divf %87, %90 : vector<8x8xf32>
    %92 = arith.truncf %91 : vector<8x8xf32> to vector<8x8xbf16>
    %93 = arith.truncf %73 : vector<8x8xf32> to vector<8x8xbf16>
    %cst_63 = arith.constant dense<0.000000e+00> : vector<8x8xf32>
    %94 = tpu.matmul %92, %93, %cst_63 {dimension_numbers = #tpu.dot_dimension_numbers<[1], [0], [0], [1], [0, 0, 1, 1], [], []>} : vector<8x8xbf16>, vector<8x8xbf16>, vector<8x8xf32> -> vector<8x8xf32>
    %95 = arith.truncf %94 : vector<8x8xf32> to vector<8x8xbf16>
    %c1_64 = arith.constant 1 : index
    %c0_65 = arith.constant 0 : index
    %c0_66 = arith.constant 0 : index
    %96 = vector.load %arg9[%c1_64, %c0_65, %c0_66] : memref<4x8x32xbf16, #tpu.memory_space<vmem>>, vector<1x8x32xbf16>
    %97 = vector.shape_cast %96 : vector<1x8x32xbf16> to vector<8x32xbf16>
    %cst_67 = arith.constant dense<0.000000e+00> : vector<8x32xf32>
    %98 = tpu.matmul %95, %97, %cst_67 {dimension_numbers = #tpu.dot_dimension_numbers<[1], [0], [0], [1], [0, 0, 1, 1], [], []>} : vector<8x8xbf16>, vector<8x32xbf16>, vector<8x32xf32> -> vector<8x32xf32>
    %99 = arith.addf %52, %98 : vector<8x32xf32>
    %c2 = arith.constant 2 : index
    %c0_68 = arith.constant 0 : index
    %c0_69 = arith.constant 0 : index
    %100 = vector.load %arg3[%c2, %c0_68, %c0_69] : memref<4x32x8xbf16, #tpu.memory_space<vmem>>, vector<1x32x8xbf16>
    %101 = vector.shape_cast %100 : vector<1x32x8xbf16> to vector<32x8xbf16>
    %cst_70 = arith.constant dense<0.000000e+00> : vector<8x8xf32>
    %102 = tpu.matmul %2, %101, %cst_70 {dimension_numbers = #tpu.dot_dimension_numbers<[1], [0], [0], [1], [0, 0, 1, 1], [], []>} : vector<8x32xbf16>, vector<32x8xbf16>, vector<8x8xf32> -> vector<8x8xf32>
    %c2_71 = arith.constant 2 : index
    %c0_72 = arith.constant 0 : index
    %c0_73 = arith.constant 0 : index
    %103 = vector.load %arg4[%c2_71, %c0_72, %c0_73] : memref<4x1x8xf32, #tpu.memory_space<vmem>>, vector<1x1x8xf32>
    %104 = vector.shape_cast %103 : vector<1x1x8xf32> to vector<1x8xf32>
    %105 = vector.broadcast %104 : vector<1x8xf32> to vector<8x8xf32>
    %106 = arith.addf %102, %105 : vector<8x8xf32>
    %c2_74 = arith.constant 2 : index
    %c0_75 = arith.constant 0 : index
    %c0_76 = arith.constant 0 : index
    %107 = vector.load %arg5[%c2_74, %c0_75, %c0_76] : memref<4x32x8xbf16, #tpu.memory_space<vmem>>, vector<1x32x8xbf16>
    %108 = vector.shape_cast %107 : vector<1x32x8xbf16> to vector<32x8xbf16>
    %cst_77 = arith.constant dense<0.000000e+00> : vector<8x8xf32>
    %109 = tpu.matmul %2, %108, %cst_77 {dimension_numbers = #tpu.dot_dimension_numbers<[1], [0], [0], [1], [0, 0, 1, 1], [], []>} : vector<8x32xbf16>, vector<32x8xbf16>, vector<8x8xf32> -> vector<8x8xf32>
    %c2_78 = arith.constant 2 : index
    %c0_79 = arith.constant 0 : index
    %c0_80 = arith.constant 0 : index
    %110 = vector.load %arg6[%c2_78, %c0_79, %c0_80] : memref<4x1x8xf32, #tpu.memory_space<vmem>>, vector<1x1x8xf32>
    %111 = vector.shape_cast %110 : vector<1x1x8xf32> to vector<1x8xf32>
    %112 = vector.broadcast %111 : vector<1x8xf32> to vector<8x8xf32>
    %113 = arith.addf %109, %112 : vector<8x8xf32>
    %c2_81 = arith.constant 2 : index
    %c0_82 = arith.constant 0 : index
    %c0_83 = arith.constant 0 : index
    %114 = vector.load %arg7[%c2_81, %c0_82, %c0_83] : memref<4x32x8xbf16, #tpu.memory_space<vmem>>, vector<1x32x8xbf16>
    %115 = vector.shape_cast %114 : vector<1x32x8xbf16> to vector<32x8xbf16>
    %cst_84 = arith.constant dense<0.000000e+00> : vector<8x8xf32>
    %116 = tpu.matmul %2, %115, %cst_84 {dimension_numbers = #tpu.dot_dimension_numbers<[1], [0], [0], [1], [0, 0, 1, 1], [], []>} : vector<8x32xbf16>, vector<32x8xbf16>, vector<8x8xf32> -> vector<8x8xf32>
    %c2_85 = arith.constant 2 : index
    %c0_86 = arith.constant 0 : index
    %c0_87 = arith.constant 0 : index
    %117 = vector.load %arg8[%c2_85, %c0_86, %c0_87] : memref<4x1x8xf32, #tpu.memory_space<vmem>>, vector<1x1x8xf32>
    %118 = vector.shape_cast %117 : vector<1x1x8xf32> to vector<1x8xf32>
    %119 = vector.broadcast %118 : vector<1x8xf32> to vector<8x8xf32>
    %120 = arith.addf %116, %119 : vector<8x8xf32>
    %121 = arith.truncf %106 : vector<8x8xf32> to vector<8x8xbf16>
    %122 = arith.truncf %113 : vector<8x8xf32> to vector<8x8xbf16>
    %cst_88 = arith.constant dense<0.000000e+00> : vector<8x8xf32>
    %123 = tpu.matmul %121, %122, %cst_88 {dimension_numbers = #tpu.dot_dimension_numbers<[1], [1], [0], [0], [0, 0, 1, 0], [], []>} : vector<8x8xbf16>, vector<8x8xbf16>, vector<8x8xf32> -> vector<8x8xf32>
    %cst_89 = arith.constant 0.353553385 : f32
    %124 = vector.broadcast %cst_89 : f32 to vector<8x8xf32>
    %125 = arith.mulf %123, %124 : vector<8x8xf32>
    %cst_90 = arith.constant 0.000000e+00 : f32
    %126 = vector.broadcast %cst_90 : f32 to vector<8x8xf32>
    %127 = arith.cmpf oeq, %4, %126 : vector<8x8xf32>
    %cst_91 = arith.constant -1.000000e+09 : f32
    %128 = vector.broadcast %cst_91 : f32 to vector<8x8xf32>
    %129 = arith.select %127, %128, %125 : vector<8x8xi1>, vector<8x8xf32>
    %cst_92 = arith.constant dense<0xFF800000> : vector<8xf32>
    %130 = vector.multi_reduction <maximumf>, %129, %cst_92 [1] : vector<8x8xf32> to vector<8xf32>
    %131 = vector.shape_cast %130 : vector<8xf32> to vector<8x1xf32>
    %132 = vector.broadcast %131 : vector<8x1xf32> to vector<8x8xf32>
    %133 = arith.subf %129, %132 : vector<8x8xf32>
    %134 = math.exp %133 : vector<8x8xf32>
    %cst_93 = arith.constant dense<0.000000e+00> : vector<8xf32>
    %135 = vector.multi_reduction <add>, %134, %cst_93 [1] : vector<8x8xf32> to vector<8xf32>
    %136 = vector.shape_cast %135 : vector<8xf32> to vector<8x1xf32>
    %137 = vector.broadcast %136 : vector<8x1xf32> to vector<8x8xf32>
    %138 = arith.divf %134, %137 : vector<8x8xf32>
    %139 = arith.truncf %138 : vector<8x8xf32> to vector<8x8xbf16>
    %140 = arith.truncf %120 : vector<8x8xf32> to vector<8x8xbf16>
    %cst_94 = arith.constant dense<0.000000e+00> : vector<8x8xf32>
    %141 = tpu.matmul %139, %140, %cst_94 {dimension_numbers = #tpu.dot_dimension_numbers<[1], [0], [0], [1], [0, 0, 1, 1], [], []>} : vector<8x8xbf16>, vector<8x8xbf16>, vector<8x8xf32> -> vector<8x8xf32>
    %142 = arith.truncf %141 : vector<8x8xf32> to vector<8x8xbf16>
    %c2_95 = arith.constant 2 : index
    %c0_96 = arith.constant 0 : index
    %c0_97 = arith.constant 0 : index
    %143 = vector.load %arg9[%c2_95, %c0_96, %c0_97] : memref<4x8x32xbf16, #tpu.memory_space<vmem>>, vector<1x8x32xbf16>
    %144 = vector.shape_cast %143 : vector<1x8x32xbf16> to vector<8x32xbf16>
    %cst_98 = arith.constant dense<0.000000e+00> : vector<8x32xf32>
    %145 = tpu.matmul %142, %144, %cst_98 {dimension_numbers = #tpu.dot_dimension_numbers<[1], [0], [0], [1], [0, 0, 1, 1], [], []>} : vector<8x8xbf16>, vector<8x32xbf16>, vector<8x32xf32> -> vector<8x32xf32>
    %146 = arith.addf %99, %145 : vector<8x32xf32>
    %c3 = arith.constant 3 : index
    %c0_99 = arith.constant 0 : index
    %c0_100 = arith.constant 0 : index
    %147 = vector.load %arg3[%c3, %c0_99, %c0_100] : memref<4x32x8xbf16, #tpu.memory_space<vmem>>, vector<1x32x8xbf16>
    %148 = vector.shape_cast %147 : vector<1x32x8xbf16> to vector<32x8xbf16>
    %cst_101 = arith.constant dense<0.000000e+00> : vector<8x8xf32>
    %149 = tpu.matmul %2, %148, %cst_101 {dimension_numbers = #tpu.dot_dimension_numbers<[1], [0], [0], [1], [0, 0, 1, 1], [], []>} : vector<8x32xbf16>, vector<32x8xbf16>, vector<8x8xf32> -> vector<8x8xf32>
    %c3_102 = arith.constant 3 : index
    %c0_103 = arith.constant 0 : index
    %c0_104 = arith.constant 0 : index
    %150 = vector.load %arg4[%c3_102, %c0_103, %c0_104] : memref<4x1x8xf32, #tpu.memory_space<vmem>>, vector<1x1x8xf32>
    %151 = vector.shape_cast %150 : vector<1x1x8xf32> to vector<1x8xf32>
    %152 = vector.broadcast %151 : vector<1x8xf32> to vector<8x8xf32>
    %153 = arith.addf %149, %152 : vector<8x8xf32>
    %c3_105 = arith.constant 3 : index
    %c0_106 = arith.constant 0 : index
    %c0_107 = arith.constant 0 : index
    %154 = vector.load %arg5[%c3_105, %c0_106, %c0_107] : memref<4x32x8xbf16, #tpu.memory_space<vmem>>, vector<1x32x8xbf16>
    %155 = vector.shape_cast %154 : vector<1x32x8xbf16> to vector<32x8xbf16>
    %cst_108 = arith.constant dense<0.000000e+00> : vector<8x8xf32>
    %156 = tpu.matmul %2, %155, %cst_108 {dimension_numbers = #tpu.dot_dimension_numbers<[1], [0], [0], [1], [0, 0, 1, 1], [], []>} : vector<8x32xbf16>, vector<32x8xbf16>, vector<8x8xf32> -> vector<8x8xf32>
    %c3_109 = arith.constant 3 : index
    %c0_110 = arith.constant 0 : index
    %c0_111 = arith.constant 0 : index
    %157 = vector.load %arg6[%c3_109, %c0_110, %c0_111] : memref<4x1x8xf32, #tpu.memory_space<vmem>>, vector<1x1x8xf32>
    %158 = vector.shape_cast %157 : vector<1x1x8xf32> to vector<1x8xf32>
    %159 = vector.broadcast %158 : vector<1x8xf32> to vector<8x8xf32>
    %160 = arith.addf %156, %159 : vector<8x8xf32>
    %c3_112 = arith.constant 3 : index
    %c0_113 = arith.constant 0 : index
    %c0_114 = arith.constant 0 : index
    %161 = vector.load %arg7[%c3_112, %c0_113, %c0_114] : memref<4x32x8xbf16, #tpu.memory_space<vmem>>, vector<1x32x8xbf16>
    %162 = vector.shape_cast %161 : vector<1x32x8xbf16> to vector<32x8xbf16>
    %cst_115 = arith.constant dense<0.000000e+00> : vector<8x8xf32>
    %163 = tpu.matmul %2, %162, %cst_115 {dimension_numbers = #tpu.dot_dimension_numbers<[1], [0], [0], [1], [0, 0, 1, 1], [], []>} : vector<8x32xbf16>, vector<32x8xbf16>, vector<8x8xf32> -> vector<8x8xf32>
    %c3_116 = arith.constant 3 : index
    %c0_117 = arith.constant 0 : index
    %c0_118 = arith.constant 0 : index
    %164 = vector.load %arg8[%c3_116, %c0_117, %c0_118] : memref<4x1x8xf32, #tpu.memory_space<vmem>>, vector<1x1x8xf32>
    %165 = vector.shape_cast %164 : vector<1x1x8xf32> to vector<1x8xf32>
    %166 = vector.broadcast %165 : vector<1x8xf32> to vector<8x8xf32>
    %167 = arith.addf %163, %166 : vector<8x8xf32>
    %168 = arith.truncf %153 : vector<8x8xf32> to vector<8x8xbf16>
    %169 = arith.truncf %160 : vector<8x8xf32> to vector<8x8xbf16>
    %cst_119 = arith.constant dense<0.000000e+00> : vector<8x8xf32>
    %170 = tpu.matmul %168, %169, %cst_119 {dimension_numbers = #tpu.dot_dimension_numbers<[1], [1], [0], [0], [0, 0, 1, 0], [], []>} : vector<8x8xbf16>, vector<8x8xbf16>, vector<8x8xf32> -> vector<8x8xf32>
    %cst_120 = arith.constant 0.353553385 : f32
    %171 = vector.broadcast %cst_120 : f32 to vector<8x8xf32>
    %172 = arith.mulf %170, %171 : vector<8x8xf32>
    %cst_121 = arith.constant 0.000000e+00 : f32
    %173 = vector.broadcast %cst_121 : f32 to vector<8x8xf32>
    %174 = arith.cmpf oeq, %4, %173 : vector<8x8xf32>
    %cst_122 = arith.constant -1.000000e+09 : f32
    %175 = vector.broadcast %cst_122 : f32 to vector<8x8xf32>
    %176 = arith.select %174, %175, %172 : vector<8x8xi1>, vector<8x8xf32>
    %cst_123 = arith.constant dense<0xFF800000> : vector<8xf32>
    %177 = vector.multi_reduction <maximumf>, %176, %cst_123 [1] : vector<8x8xf32> to vector<8xf32>
    %178 = vector.shape_cast %177 : vector<8xf32> to vector<8x1xf32>
    %179 = vector.broadcast %178 : vector<8x1xf32> to vector<8x8xf32>
    %180 = arith.subf %176, %179 : vector<8x8xf32>
    %181 = math.exp %180 : vector<8x8xf32>
    %cst_124 = arith.constant dense<0.000000e+00> : vector<8xf32>
    %182 = vector.multi_reduction <add>, %181, %cst_124 [1] : vector<8x8xf32> to vector<8xf32>
    %183 = vector.shape_cast %182 : vector<8xf32> to vector<8x1xf32>
    %184 = vector.broadcast %183 : vector<8x1xf32> to vector<8x8xf32>
    %185 = arith.divf %181, %184 : vector<8x8xf32>
    %186 = arith.truncf %185 : vector<8x8xf32> to vector<8x8xbf16>
    %187 = arith.truncf %167 : vector<8x8xf32> to vector<8x8xbf16>
    %cst_125 = arith.constant dense<0.000000e+00> : vector<8x8xf32>
    %188 = tpu.matmul %186, %187, %cst_125 {dimension_numbers = #tpu.dot_dimension_numbers<[1], [0], [0], [1], [0, 0, 1, 1], [], []>} : vector<8x8xbf16>, vector<8x8xbf16>, vector<8x8xf32> -> vector<8x8xf32>
    %189 = arith.truncf %188 : vector<8x8xf32> to vector<8x8xbf16>
    %c3_126 = arith.constant 3 : index
    %c0_127 = arith.constant 0 : index
    %c0_128 = arith.constant 0 : index
    %190 = vector.load %arg9[%c3_126, %c0_127, %c0_128] : memref<4x8x32xbf16, #tpu.memory_space<vmem>>, vector<1x8x32xbf16>
    %191 = vector.shape_cast %190 : vector<1x8x32xbf16> to vector<8x32xbf16>
    %cst_129 = arith.constant dense<0.000000e+00> : vector<8x32xf32>
    %192 = tpu.matmul %189, %191, %cst_129 {dimension_numbers = #tpu.dot_dimension_numbers<[1], [0], [0], [1], [0, 0, 1, 1], [], []>} : vector<8x8xbf16>, vector<8x32xbf16>, vector<8x32xf32> -> vector<8x32xf32>
    %193 = arith.addf %146, %192 : vector<8x32xf32>
    %c0_130 = arith.constant 0 : index
    %c0_131 = arith.constant 0 : index
    %194 = vector.load %arg10[%c0_130, %c0_131] : memref<1x32xf32, #tpu.memory_space<vmem>>, vector<1x32xf32>
    %195 = vector.broadcast %194 : vector<1x32xf32> to vector<8x32xf32>
    %196 = arith.addf %193, %195 : vector<8x32xf32>
    %c0_132 = arith.constant 0 : index
    %c0_133 = arith.constant 0 : index
    %c0_134 = arith.constant 0 : index
    %197 = vector.load %arg11[%c0_132, %c0_133, %c0_134] : memref<1x8x32xf32, #tpu.memory_space<vmem>>, vector<1x8x32xf32>
    %198 = vector.shape_cast %197 : vector<1x8x32xf32> to vector<8x32xf32>
    %199 = vector.shape_cast %196 : vector<8x32xf32> to vector<1x8x32xf32>
    tpu.vector_store %arg11[%c0_132, %c0_133, %c0_134], %199 {strides = array<i32>} : memref<1x8x32xf32, #tpu.memory_space<vmem>>, vector<1x8x32xf32>,
    return
  }
  func.func @transform_0(%arg0: i32) -> (i32, i32, i32) {
    %c0_i32 = arith.constant 0 : i32
    %c0_i32_0 = arith.constant 0 : i32
    %c0_i32_1 = arith.constant 0 : i32
    return %arg0, %c0_i32, %c0_i32_0 : i32, i32, i32
  }
  func.func @transform_1(%arg0: i32) -> (i32, i32, i32) {
    %c0_i32 = arith.constant 0 : i32
    %c0_i32_0 = arith.constant 0 : i32
    %c0_i32_1 = arith.constant 0 : i32
    return %arg0, %c0_i32, %c0_i32_0 : i32, i32, i32
  }
  func.func @transform_2(%arg0: i32) -> (i32, i32, i32) {
    %c0_i32 = arith.constant 0 : i32
    %c0_i32_0 = arith.constant 0 : i32
    %c0_i32_1 = arith.constant 0 : i32
    %c0_i32_2 = arith.constant 0 : i32
    return %c0_i32, %c0_i32_0, %c0_i32_1 : i32, i32, i32
  }
  func.func @transform_3(%arg0: i32) -> (i32, i32, i32) {
    %c0_i32 = arith.constant 0 : i32
    %c0_i32_0 = arith.constant 0 : i32
    %c0_i32_1 = arith.constant 0 : i32
    %c0_i32_2 = arith.constant 0 : i32
    return %c0_i32, %c0_i32_0, %c0_i32_1 : i32, i32, i32
  }
  func.func @transform_4(%arg0: i32) -> (i32, i32, i32) {
    %c0_i32 = arith.constant 0 : i32
    %c0_i32_0 = arith.constant 0 : i32
    %c0_i32_1 = arith.constant 0 : i32
    %c0_i32_2 = arith.constant 0 : i32
    return %c0_i32, %c0_i32_0, %c0_i32_1 : i32, i32, i32
  }
  func.func @transform_5(%arg0: i32) -> (i32, i32, i32) {
    %c0_i32 = arith.constant 0 : i32
    %c0_i32_0 = arith.constant 0 : i32
    %c0_i32_1 = arith.constant 0 : i32
    %c0_i32_2 = arith.constant 0 : i32
    return %c0_i32, %c0_i32_0, %c0_i32_1 : i32, i32, i32
  }
  func.func @transform_6(%arg0: i32) -> (i32, i32, i32) {
    %c0_i32 = arith.constant 0 : i32
    %c0_i32_0 = arith.constant 0 : i32
    %c0_i32_1 = arith.constant 0 : i32
    %c0_i32_2 = arith.constant 0 : i32
    return %c0_i32, %c0_i32_0, %c0_i32_1 : i32, i32, i32
  }
  func.func @transform_7(%arg0: i32) -> (i32, i32, i32) {
    %c0_i32 = arith.constant 0 : i32
    %c0_i32_0 = arith.constant 0 : i32
    %c0_i32_1 = arith.constant 0 : i32
    %c0_i32_2 = arith.constant 0 : i32
    return %c0_i32, %c0_i32_0, %c0_i32_1 : i32, i32, i32
  }
  func.func @transform_8(%arg0: i32) -> (i32, i32, i32) {
    %c0_i32 = arith.constant 0 : i32
    %c0_i32_0 = arith.constant 0 : i32
    %c0_i32_1 = arith.constant 0 : i32
    %c0_i32_2 = arith.constant 0 : i32
    return %c0_i32, %c0_i32_0, %c0_i32_1 : i32, i32, i32
  }
  func.func @transform_9(%arg0: i32) -> (i32, i32) {
    %c0_i32 = arith.constant 0 : i32
    %c0_i32_0 = arith.constant 0 : i32
    %c0_i32_1 = arith.constant 0 : i32
    return %c0_i32, %c0_i32_0 : i32, i32
  }
  func.func @transform_10(%arg0: i32) -> (i32, i32, i32) {
    %c0_i32 = arith.constant 0 : i32
    %c0_i32_0 = arith.constant 0 : i32
    %c0_i32_1 = arith.constant 0 : i32
    return %arg0, %c0_i32, %c0_i32_0 : i32, i32, i32
  }
}

</mosaic_0001>

<bundles_post_ra>
// kernel: tpu_custom_call.1
= control target key start
LH: loop header
LB: loop body
LE: loop exit
PB: predicated region body
PF: predicated region fallthrough
CT: control target
= control target key end

     0   :  { %15 = vsyncpa [#allocation3], 0  ;;  %s2832_s0 = inlined_call_operand.vmem [shape: f32[2,8,32], index: 0, kind: input, shape index: {}]   ;;  %s2833_s1 = inlined_call_operand.vmem [shape: f32[2,8,8], index: 1, kind: input, shape index: {}]   ;;  %s2834_s2 = inlined_call_operand.vmem [shape: bf16[4,32,8], index: 2, kind: input, shape index: {}]   ;;  %s2835_s3 = inlined_call_operand.vmem [shape: f32[4,1,8], index: 3, kind: input, shape index: {}]   ;;  %s2836_s4 = inlined_call_operand.vmem [shape: bf16[4,32,8], index: 4, kind: input, shape index: {}]   ;;  %s2837_s5 = inlined_call_operand.vmem [shape: f32[4,1,8], index: 5, kind: input, shape index: {}]   ;;  %s2838_s6 = inlined_call_operand.vmem [shape: bf16[4,32,8], index: 6, kind: input, shape index: {}]   ;;  %s2839_s7 = inlined_call_operand.vmem [shape: f32[4,1,8], index: 7, kind: input, shape index: {}]   ;;  %s2840_s8 = inlined_call_operand.vmem [shape: bf16[4,8,32], index: 8, kind: input, shape index: {}]   ;;  %s2841_s9 = inlined_call_operand.vmem [shape: f32[1,32], index: 9, kind: input, shape index: {}]   ;;  %s2842_s10 = inlined_call_operand.hbm [shape: f32[2,8,32], index: 10, kind: output, shape index: {}]  }
   0x1   :  { %17 = vsyncpa [#allocation3 + $0x1], 0  ;;  %s2433_s13 = smov 0   ;;  %s2435_s14 = smov 0  }
   0x2   :  { %s2437_s15 = smov 0   ;;  %s2439_s16 = smov 0  }
   0x3 LB: > { %s2454_s17 = sadd.s32 4294967295, %s2373_s16   ;;  %s1884_s18 = sadd.s32 4294967294, %s2373_s16   ;;  %s2373_s16 = sphi %s2439_s16, %s2848_s16   ;;  %s2369_s15 = sphi %s2437_s15, %s2847_s15   ;;  %s2365_s14 = sphi %s2435_s14, %s2846_s14   ;;  %s2361_s13 = sphi %s2433_s13, %s2845_s13  }
   0x4   : > { %s2458_s19 = sadd.s32 1, %s2373_s16   ;;  %s250_s20 = sadd.s32 1, %s2369_s15 }
   0x5   : > { %s247_s21 = ssub.s32 %s2373_s16, %s2458_s19  ;;  %p260_p0 = scmp.ne.s32.totalorder %s2369_s15, %s2365_s14 }
   0x6   : > { %p248_p1 = scmp.eq.s32.totalorder %s247_s21, 0  ;;  %p261_p2 = scmp.eq.s32.totalorder %s2454_s17, 1 }
   0x7   : > { %p266_p3 = scmp.ne.s32.totalorder %s2365_s14, %s2361_s13  ;;  %p267_p4 = scmp.eq.s32.totalorder %s1884_s18, 1 }
   0x8   : > { %s2469_s22 = scalar_select %p248_p1, %s2369_s15, %s250_s20  }
   0x9   : > { %p2471_p5 = por %p261_p2, %p260_p0  ;;  %p2475_p6 = por %p267_p4, %p266_p3 }
   0xa   : > { %p1887_p7 = scmp.ge.s32.totalorder %s2373_s16, 1  ;;  %p323_p8 = scmp.lt.s32.totalorder %s2373_s16, 3 }
   0xc   : > { %p324_p9 = pnand %p1887_p7, %p323_p8 }
   0xd   : > { %p364_p10 = scmp.lt.s32.totalorder (!%p324_p9), %s2454_s17, 1  ;;  %s361_s27 = sand.u32 (!%p324_p9), 1, %s2365_s14  }
   0xe   : > { %327 = sbr.rel (%p324_p9) target bundleno = 3700 (0xe74), region = 60  ;;  %s2001_s29 = sshll.u32 (!%p324_p9), %s2454_s17, 7 }
   0xf   : > { %s2790_s25 = scalar_lea.hbm (!%p324_p9), %s2842_s10, %s2001_s29 }
  0x13   : > { %v2273_v0 = vld [vmem:[%s2836_s4 + $0x8] sm:$0xff]   ;;  %v2375_v1 = vmov 0.0   ;;  %v2275_v3 = vld [vmem:[%s2836_s4] sm:$0xff]   ;;  %vm2376_vm0 = vmmov 0   ;;  %s2501_s18 = scalar_select %p364_p10, %s2454_s17, 1  ;;  %vm399_vm1 = vcmask 261120  }
  0x14   : > { %2072 = vmatprep.subr.bf16.mxu1 %v2375_v1  ;;  %2064 = vmatprep.subr.bf16.mxu0 %v2375_v1  ;;  %v2274_v2 = vld [vmem:[%s2834_s2 + $0x8] sm:$0xff]   ;;  %v2276_v4 = vld [vmem:[%s2834_s2] sm:$0xff]   ;;  %vm571_vm2 = vcmask 64512   ;;  %vm637_vm4 = vcmask 1043456   ;;  %v2280_v45 = vld [vmem:[%s2834_s2 + $0x18] sm:$0xff]   ;;  %s1800_s17 = scalar_lea.sflag [#allocation3], %s361_s27 }
  0x15   : > { %2073 = vmatpush3.bf16.msra.mxu1 %v2273_v0  ;;  %2076 = vmatprep.mubr.msk.bf16.mxu1 %vm2376_vm0, %v2375_v1  ;;  %s1889_s20 = sshll.u32 %s2501_s18, 3  ;;  %v1895_v7 = vld [vmem:[%s2837_s5] ss:$0 sm:$0xff]  ;;  %v2277_v22 = vld [vmem:[%s2838_s6 + $0x8] sm:$0xff]   ;;  %v2282_v46 = vld [vmem:[%s2834_s2 + $0x10] sm:$0xff]  }
  0x16   : > { %2065 = vmatpush3.bf16.msra.mxu0 %v2274_v2  ;;  %2074 = vmatprep.subr.bf16.mxu1 %v2375_v1  ;;  %s367_s26 = scalar_lea.vmem %s2832_s0, %s1889_s20  ;;  %v1891_v11 = vld [vmem:[%s2835_s3] ss:$0 sm:$0xff]  ;;  %s371_s28 = scalar_lea.vmem %s2833_s1, %s1889_s20  ;;  %v2279_v50 = vld [vmem:[%s2836_s4 + $0x18] sm:$0xff]   ;;  %v2281_v52 = vld [vmem:[%s2836_s4 + $0x10] sm:$0xff]  }
  0x17   : > { %2066 = vmatprep.subr.bf16.mxu0 %v2375_v1  ;;  %2068 = vmatprep.mubr.msk.bf16.mxu0 %vm2376_vm0, %v2375_v1  ;;  %v373_v5 = vld [vmem:[%s367_s26] sm:$0xff] }
  0x18   : > { %v2513_v6 = vpack.c.bf16 %v373_v5, %v373_v5  ;;  %v2278_v23 = vld [vmem:[%s2838_s6] sm:$0xff]  }
  0x19   : > { %2075 = vmatpush3.bf16.msra.mxu1 %v2275_v3  ;;  %v2551_v24 = vld [vmem:[%s371_s28] sm:$0xff]  ;;  %s1888_s28 = sshll.u32 %s361_s27, 3 }
  0x1a   : > { %2067 = vmatpush3.bf16.msra.mxu0 %v2276_v4  ;;  %2088 = vmatprep.subr.bf16.mxu1 %v2375_v1  ;;  %vm619_vm3 = vcmp.eq.f32.partialorder %v2551_v24, 0.0  ;;  %v1899_v37 = vld [vmem:[%s2839_s7] ss:$0 sm:$0xff]  ;;  %v1919_v61 = vld [vmem:[%s2837_s5 + $0x1] ss:$0 sm:$0xff]  ;;  %s363_s30 = scalar_lea.vmem [#allocation2], %s1888_s28 }
  0x1b   : > { %2080 = vmatprep.subr.bf16.mxu0 %v2375_v1  ;;  %v1910_v0 = vld [vmem:[%s2835_s3 + $0x1] ss:$0 sm:$0xff]  ;;  %s1813_s11 = sshll.u32 %s363_s30, 4  ;;  %s2377_s28 = smov [#allocation2]   ;;  %s2792_s11 = int_to_ptr.vmem [resolvable:$true] %s1813_s11 }
  0x1c   : > { %2077 = vmatmul.mubr.msk.bf16.vlgmr.msra.gmra.mxu1 %vm399_vm1, %v2513_v6  ;;  %s2313_s26 = scalar_lea.vmem %s2792_s11, 128  ;;  %s2317_s18 = sshll.u32 %s2377_s28, 4  ;;  %s2318_s18 = int_to_ptr.vmem [resolvable:$false] %s2317_s18 }
  0x1d   : > { %2069 = vmatmul.mubr.msk.bf16.vlgmr.msra.gmra.mxu0 %vm399_vm1, %v2513_v6  ;;  %2090 = vmatprep.mubr.msk.bf16.mxu1 %vm2376_vm0, %v2375_v1  ;;  %p2314_p11 = scmp.ne.s32.totalorder %s2792_s11, %s2313_s26  ;;  %s2319_s20 = scalar_lea.vmem %s2318_s18, 256 }
  0x1e   : > { %2084 = vmatprep.mubr.msk.bf16.mxu0 %vm2376_vm0, %v2375_v1  ;;  %2081 = vmatpush3.bf16.msra.mxu0 %v2277_v22  ;;  %p2320_p0 = scmp.lt.s32.totalorder %s2792_s11, %s2318_s18  ;;  %p2321_p1 = scmp.lt.s32.totalorder %s2319_s20, %s2313_s26 }
  0x1f   : > { %2082 = vmatprep.subr.bf16.mxu0 %v2375_v1  ;;  %p2315_p12 = pnand %p2314_p11, %p2471_p5 }
  0x20   : > { %p2322_p2 = por %p2321_p1, %p2320_p0 }
  0x21   : > { %p2316_p13 = pneg %p2315_p12 }
  0x22   : > { %2083 = vmatpush3.bf16.msra.mxu0 %v2278_v23 }
  0x23   : > { %2094 = vmatprep.subr.bf16.mxu0 %v2375_v1  ;;  %p2323_p3 = pnand %p2322_p2, %p2316_p13 }
  0x25   : > { %2085 = vmatmul.mubr.msk.bf16.vlgmr.msra.gmra.mxu0 %vm399_vm1, %v2513_v6 }
  0x26   : > { %2096 = vmatprep.mubr.msk.bf16.mxu0 %vm2376_vm0, %v2375_v1 }
  0xdc   : > { %v500_v8 = vpop.f32.mrf.mxu1 }
  0xdd   : > { %v437_v9 = vpop.f32.mrf.mxu0  ;;  %v501_v10 = vadd.f32 %v1895_v7, %v500_v8 }
  0xde   : > { %v2078_v12 = vpop.f32.mrf.mxu1  ;;  %v438_v18 = vadd.f32 %v1891_v11, %v437_v9  ;;  %v2284_v11 = vld [vmem:[%s2838_s6 + $0x10] sm:$0xff]  }
  0xdf   : > { %v2070_v13 = vpop.f32.mrf.mxu0  ;;  %v570_v14 = vpack.c.bf16 %v501_v10, %v501_v10  ;;  %v2283_v10 = vld [vmem:[%s2838_s6 + $0x18] sm:$0xff]  }
  0xe0   : > { %v503_v15 = vpop.f32.mrf.mxu1  ;;  %v569_v21 = vpack.c.bf16 %v438_v18, %v438_v18 }
  0xe1   : > { %v440_v16 = vpop.f32.mrf.mxu0  ;;  %v576_v17 = vsel %vm571_vm2, %v570_v14, 0 }
  0xe2   : > { %v2079_v19 = vpop.f32.mrf.mxu1  ;;  %2089 = vmatpush3.bf16.xpose.msra.mxu1 %v576_v17 }
  0xe3   : > { %v2071_v20 = vpop.f32.mrf.mxu0  ;;  %2100 = vmatprep.subr.bf16.mxu1 %v2375_v1  ;;  %v1928_v19 = vld [vmem:[%s2839_s7 + $0x1] ss:$0 sm:$0xff] }
  0xe5   : > { %v563_v38 = vpop.f32.mrf.mxu0 }
  0xe6   : > { %v564_v39 = vadd.f32 %v1899_v37, %v563_v38  ;;  %v682_v37 = vld [vmem:[%s2840_s8] sm:$0xf] }
  0xe7   : > { %v2086_v40 = vpop.f32.mrf.mxu0 }
  0xe8   : > { %v633_v41 = vpack.c.bf16 %v564_v39, %v564_v39  ;;  %v1040_v40 = vsel %vm637_vm4, %v682_v37, 0 }
  0xe9   : > { %2091 = vmatmul.mubr.msk.bf16.vlgmr.msra.gmra.mxu1 %vm571_vm2, %v569_v21  ;;  %v566_v42 = vpop.f32.mrf.mxu0 }
  0xea   : > { %2104 = vmatprep.mubr.msk.bf16.mxu1 %vm2376_vm0, %v2375_v1  ;;  %v639_v43 = vsel %vm637_vm4, %v633_v41, 0  ;;  %2101 = vmatpush3.bf16.msra.mxu1 %v2280_v45  ;;  %v2285_v41 = vld [vmem:[%s2836_s4 + $0x28] sm:$0xff]  }
  0xeb   : > { %v2087_v44 = vpop.f32.mrf.mxu0  ;;  %2095 = vmatpush3.bf16.msra.mxu0 %v639_v43  ;;  %2102 = vmatprep.subr.bf16.mxu1 %v2375_v1  ;;  %v2286_v43 = vld [vmem:[%s2836_s4 + $0x20] sm:$0xff]   ;;  %v2287_v45 = vld [vmem:[%s2834_s2 + $0x28] sm:$0xff]  }
  0xec   : > { %2108 = vmatprep.subr.bf16.mxu0 %v2375_v1 }
  0xee   : > { %2103 = vmatpush3.bf16.msra.mxu1 %v2282_v46 }
  0xef   : > { %2116 = vmatprep.subr.bf16.mxu1 %v2375_v1 }
  0xf1   : > { %2105 = vmatmul.mubr.msk.bf16.vlgmr.msra.gmra.mxu1 %vm399_vm1, %v2513_v6 }
  0xf2   : > { %2120 = vmatprep.mubr.msk.bf16.mxu1 %vm2376_vm0, %v2375_v1  ;;  %2117 = vmatpush3.bf16.msra.mxu1 %v2283_v10 }
  0xf3   : > { %2118 = vmatprep.subr.bf16.mxu1 %v2375_v1 }
  0xf6   : > { %2119 = vmatpush3.bf16.msra.mxu1 %v2284_v11 }
  0xf7   : > { %2130 = vmatprep.subr.bf16.mxu1 %v2375_v1 }
  0xf9   : > { %2121 = vmatmul.mubr.msk.bf16.vlgmr.msra.gmra.mxu1 %vm399_vm1, %v2513_v6 }
  0xfa   : > { %2132 = vmatprep.mubr.msk.bf16.mxu1 %vm2376_vm0, %v2375_v1 }
 0x1a9   : > { %v612_v25 = vpop.f32.mrf.mxu1 }
 0x1aa   : > { %v618_v26 = vmul.f32 0.35355338, %v612_v25 }
 0x1ab   : > { %v2092_v27 = vpop.f32.mrf.mxu1 }
 0x1ac   : > { %v620_v28 = vsel %vm619_vm3, -1e+09, %v618_v26 }
 0x1ad   : > { %v615_v29 = vpop.f32.mrf.mxu1  ;;  %v621_v30 = vsel %vm571_vm2, %v620_v28, -inf }
 0x1ae   : > { %622 = vmax.xlane.f32.xlu0 %v621_v30 }
 0x1af   : > { %v2093_v31 = vpop.f32.mrf.mxu1 }
 0x1b1   : > { %v742_v53 = vpop.f32.mrf.mxu1 }
 0x1b2   : > { %v743_v7 = vadd.f32 %v1910_v0, %v742_v53 }
 0x1b3   : > { %v2106_v54 = vpop.f32.mrf.mxu1 }
 0x1b4   : > { %v878_v9 = vpack.c.bf16 %v743_v7, %v743_v7 }
 0x1b5   : > { %v745_v55 = vpop.f32.mrf.mxu1 }
 0x1b6   : > { %v1951_v55 = vld [vmem:[%s2837_s5 + $0x2] ss:$0 sm:$0xff] }
 0x1b7   : > { %v2107_v56 = vpop.f32.mrf.mxu1 }
 0x1b9   : > { %v872_v20 = vpop.f32.mrf.mxu1 }
 0x1ba   : > { %v873_v21 = vadd.f32 %v1928_v19, %v872_v20 }
 0x1bb   : > { %v2122_v22 = vpop.f32.mrf.mxu1 }
 0x1bc   : > { %v940_v23 = vpack.c.bf16 %v873_v21, %v873_v21 }
 0x1bd   : > { %v875_v25 = vpop.f32.mrf.mxu1 }
 0x1be   : > { %v945_v26 = vsel %vm637_vm4, %v940_v23, 0 }
 0x1bf   : > { %v2123_v27 = vpop.f32.mrf.mxu1  ;;  %2131 = vmatpush3.bf16.msra.mxu1 %v945_v26 }
 0x1c0   : > { %2142 = vmatprep.subr.bf16.mxu1 %v2375_v1  ;;  %v1960_v27 = vld [vmem:[%s2839_s7 + $0x2] ss:$0 sm:$0xff] }
 0x237   : > { %v623_v32 = vpop.xlane.xlu0 %622 }
 0x238   : > { %v624_v33 = vsub.f32 %v620_v28, %v623_v32 }
 0x23a   : > { %v625_v34 = vmul.f32 1.442695, %v624_v33  ;;  %v1934_v33 = vld [vmem:[%s2840_s8 + $0x4] sm:$0xf] }
 0x23c   : > { %2297 = vpow2.f32 %v625_v34  ;;  %v994_v34 = vsel %vm637_vm4, %v1934_v33, 0 }
 0x249   : > { %v2298_v35 = vpop.eup %2297 }
 0x24a   : > { %v627_v36 = vsel %vm571_vm2, %v2298_v35, 0.0 }
 0x24b   : > { %628 = vadd.xlane.f32.xlu0 %v627_v36 }
 0x2d4   : > { %v629_v47 = vpop.xlane.xlu0 %628 }
 0x2d5   : > { %2299 = vrcp.f32 %v629_v47 }
 0x2e2   : > { %v2300_v48 = vpop.eup %2299 }
 0x2e3   : > { %v631_v49 = vmul.f32 %v2300_v48, %v2298_v35 }
 0x2e5   : > { %v632_v51 = vpack.c.bf16 %v631_v49, %v631_v49  ;;  %v2288_v49 = vld [vmem:[%s2834_s2 + $0x20] sm:$0xff]  }
 0x2e7   : > { %2097 = vmatmul.mubr.msk.bf16.vlgmr.msra.gmra.mxu0 %vm571_vm2, %v632_v51 }
 0x2e8   : > { %2109 = vmatpush3.bf16.msra.mxu0 %v2279_v50  ;;  %2112 = vmatprep.mubr.msk.bf16.mxu0 %vm2376_vm0, %v2375_v1 }
 0x2e9   : > { %2110 = vmatprep.subr.bf16.mxu0 %v2375_v1 }
 0x2ec   : > { %2111 = vmatpush3.bf16.msra.mxu0 %v2281_v52 }
 0x2ed   : > { %2124 = vmatprep.subr.bf16.mxu0 %v2375_v1 }
 0x2ef   : > { %2113 = vmatmul.mubr.msk.bf16.vlgmr.msra.gmra.mxu0 %vm399_vm1, %v2513_v6 }
 0x2f0   : > { %2126 = vmatprep.mubr.msk.bf16.mxu0 %vm2376_vm0, %v2375_v1 }
 0x3a7   : > { %v2590_v57 = vpop.f32.mrf.mxu0 }
 0x3a8   : > { %v681_v42 = vpack.c.bf16 %v2590_v57, %v2590_v57 }
 0x3a9   : > { %v2098_v58 = vpop.f32.mrf.mxu0 }
 0x3ab   : > { %v678_v59 = vpop.f32.mrf.mxu0 }
 0x3ad   : > { %v2099_v60 = vpop.f32.mrf.mxu0 }
 0x3af   : > { %v807_v62 = vpop.f32.mrf.mxu0 }
 0x3b0   : > { %v808_v63 = vadd.f32 %v1919_v61, %v807_v62 }
 0x3b1   : > { %v2114_v2 = vpop.f32.mrf.mxu0 }
 0x3b2   : > { %v879_v3 = vpack.c.bf16 %v808_v63, %v808_v63 }
 0x3b3   : > { %v810_v4 = vpop.f32.mrf.mxu0 }
 0x3b4   : > { %v884_v5 = vsel %vm571_vm2, %v879_v3, 0  ;;  %v1942_v4 = vld [vmem:[%s2835_s3 + $0x2] ss:$0 sm:$0xff] }
 0x3b5   : > { %v2115_v8 = vpop.f32.mrf.mxu0  ;;  %2125 = vmatpush3.bf16.xpose.msra.mxu0 %v884_v5 }
 0x3b6   : > { %2136 = vmatprep.subr.bf16.mxu0 %v2375_v1 }
 0x3bc   : > { %2127 = vmatmul.mubr.msk.bf16.vlgmr.msra.gmra.mxu0 %vm571_vm2, %v878_v9 }
 0x3bd   : > { %2138 = vmatprep.mubr.msk.bf16.mxu0 %vm2376_vm0, %v2375_v1  ;;  %2137 = vmatpush3.bf16.msra.mxu0 %v994_v34 }
 0x3be   : > { %2148 = vmatprep.subr.bf16.mxu0 %v2375_v1 }
 0x47c   : > { %v920_v12 = vpop.f32.mrf.mxu0 }
 0x47d   : > { %v926_v13 = vmul.f32 0.35355338, %v920_v12  ;;  %v2289_v12 = vld [vmem:[%s2838_s6 + $0x28] sm:$0xff]  }
 0x47e   : > { %v2128_v14 = vpop.f32.mrf.mxu0 }
 0x47f   : > { %v927_v15 = vsel %vm619_vm3, -1e+09, %v926_v13  ;;  %v2290_v13 = vld [vmem:[%s2838_s6 + $0x20] sm:$0xff]  }
 0x480   : > { %v923_v16 = vpop.f32.mrf.mxu0  ;;  %v928_v17 = vsel %vm571_vm2, %v927_v15, -inf }
 0x481   : > { %929 = vmax.xlane.f32.xlu1 %v928_v17 }
 0x482   : > { %v2129_v18 = vpop.f32.mrf.mxu0 }
 0x50a   : > { %v930_v28 = vpop.xlane.xlu1 %929 }
 0x50b   : > { %v931_v29 = vsub.f32 %v927_v15, %v930_v28 }
 0x50d   : > { %v932_v30 = vmul.f32 1.442695, %v931_v29 }
 0x50f   : > { %2301 = vpow2.f32 %v932_v30 }
 0x51c   : > { %v2302_v31 = vpop.eup %2301 }
 0x51d   : > { %v934_v32 = vsel %vm571_vm2, %v2302_v31, 0.0 }
 0x51e   : > { %935 = vadd.xlane.f32.xlu1 %v934_v32 }
 0x5a7   : > { %v936_v35 = vpop.xlane.xlu1 %935 }
 0x5a8   : > { %2303 = vrcp.f32 %v936_v35  ;;  %v1966_v35 = vld [vmem:[%s2840_s8 + $0x8] sm:$0xf] }
 0x5b5   : > { %v2304_v36 = vpop.eup %2303 }
 0x5b6   : > { %v938_v38 = vmul.f32 %v2304_v36, %v2302_v31  ;;  %v1393_v36 = vsel %vm637_vm4, %v1966_v35, 0 }
 0x5b8   : > { %v939_v39 = vpack.c.bf16 %v938_v38, %v938_v38 }
 0x5ba   : > { %2133 = vmatmul.mubr.msk.bf16.vlgmr.msra.gmra.mxu1 %vm571_vm2, %v939_v39 }
 0x5bb   : > { %2143 = vmatpush3.bf16.msra.mxu1 %v1040_v40  ;;  %2144 = vmatprep.mubr.msk.bf16.mxu1 %vm2376_vm0, %v2375_v1 }
 0x5bc   : > { %2156 = vmatprep.subr.bf16.mxu1 %v2375_v1 }
 0x5c2   : > { %2145 = vmatmul.mubr.msk.bf16.vlgmr.msra.gmra.mxu1 %vm571_vm2, %v681_v42  ;;  %v2294_v42 = vld [vmem:[%s2834_s2 + $0x30] sm:$0xff]  }
 0x5c3   : > { %2157 = vmatpush3.bf16.msra.mxu1 %v2285_v41  ;;  %2160 = vmatprep.mubr.msk.bf16.mxu1 %vm2376_vm0, %v2375_v1  ;;  %v2292_v41 = vld [vmem:[%s2834_s2 + $0x38] sm:$0xff]  }
 0x5c4   : > { %2158 = vmatprep.subr.bf16.mxu1 %v2375_v1 }
 0x5c7   : > { %2159 = vmatpush3.bf16.msra.mxu1 %v2286_v43 }
 0x5c8   : > { %2172 = vmatprep.subr.bf16.mxu1 %v2375_v1 }
 0x5ca   : > { %2161 = vmatmul.mubr.msk.bf16.vlgmr.msra.gmra.mxu1 %vm399_vm1, %v2513_v6 }
 0x5cb   : > { %2174 = vmatprep.mubr.msk.bf16.mxu1 %vm2376_vm0, %v2375_v1 }
 0x67a   : > { %v981_v44 = vpop.f32.mrf.mxu1 }
 0x67b   : > { %v987_v46 = vpack.c.bf16 %v981_v44, %v981_v44  ;;  %v2291_v44 = vld [vmem:[%s2836_s4 + $0x38] sm:$0xff]  }
 0x67c   : > { %v2134_v47 = vpop.f32.mrf.mxu1 }
 0x67d   : > { %2139 = vmatmul.mubr.msk.bf16.vlgmr.msra.gmra.mxu0 %vm571_vm2, %v987_v46 }
 0x67e   : > { %v984_v48 = vpop.f32.mrf.mxu1  ;;  %2149 = vmatpush3.bf16.msra.mxu0 %v2287_v45  ;;  %2152 = vmatprep.mubr.msk.bf16.mxu0 %vm2376_vm0, %v2375_v1 }
 0x67f   : > { %2150 = vmatprep.subr.bf16.mxu0 %v2375_v1  ;;  %v2293_v48 = vld [vmem:[%s2836_s4 + $0x30] sm:$0xff]  }
 0x680   : > { %v2135_v50 = vpop.f32.mrf.mxu1 }
 0x682   : > { %v2664_v51 = vpop.f32.mrf.mxu1  ;;  %2151 = vmatpush3.bf16.msra.mxu0 %v2288_v49 }
 0x683   : > { %2164 = vmatprep.subr.bf16.mxu0 %v2375_v1 }
 0x684   : > { %v2146_v52 = vpop.f32.mrf.mxu1 }
 0x685   : > { %2153 = vmatmul.mubr.msk.bf16.vlgmr.msra.gmra.mxu0 %vm399_vm1, %v2513_v6 }
 0x686   : > { %v1079_v53 = vpop.f32.mrf.mxu1  ;;  %2168 = vmatprep.mubr.msk.bf16.mxu0 %vm2376_vm0, %v2375_v1  ;;  %2165 = vmatpush3.bf16.msra.mxu0 %v2289_v12 }
 0x687   : > { %2166 = vmatprep.subr.bf16.mxu0 %v2375_v1 }
 0x688   : > { %v2147_v54 = vpop.f32.mrf.mxu1 }
 0x68a   : > { %v1206_v56 = vpop.f32.mrf.mxu1  ;;  %2167 = vmatpush3.bf16.msra.mxu0 %v2290_v13 }
 0x68b   : > { %v1207_v57 = vadd.f32 %v1951_v55, %v1206_v56  ;;  %2178 = vmatprep.subr.bf16.mxu0 %v2375_v1 }
 0x68c   : > { %v2162_v58 = vpop.f32.mrf.mxu1 }
 0x68d   : > { %v1278_v59 = vpack.c.bf16 %v1207_v57, %v1207_v57  ;;  %2169 = vmatmul.mubr.msk.bf16.vlgmr.msra.gmra.mxu0 %vm399_vm1, %v2513_v6 }
 0x68e   : > { %v1209_v60 = vpop.f32.mrf.mxu1  ;;  %2180 = vmatprep.mubr.msk.bf16.mxu0 %vm2376_vm0, %v2375_v1 }
 0x68f   : > { %v1283_v61 = vsel %vm571_vm2, %v1278_v59, 0 }
 0x690   : > { %v2163_v62 = vpop.f32.mrf.mxu1  ;;  %2173 = vmatpush3.bf16.xpose.msra.mxu1 %v1283_v61  ;;  %v1982_v61 = vld [vmem:[%s2837_s5 + $0x3] ss:$0 sm:$0xff] }
 0x691   : > { %2184 = vmatprep.subr.bf16.mxu1 %v2375_v1 }
 0x73d   : > { %v2676_v63 = vpop.f32.mrf.mxu0 }
 0x73e   : > { %v1077_v55 = vadd.f32 %v2664_v51, %v2676_v63 }
 0x73f   : > { %v2140_v0 = vpop.f32.mrf.mxu0 }
 0x741   : > { %v1033_v2 = vpop.f32.mrf.mxu0 }
 0x743   : > { %v2141_v3 = vpop.f32.mrf.mxu0 }
 0x744   : > { %v1973_v3 = vld [vmem:[%s2835_s3 + $0x3] ss:$0 sm:$0xff] }
 0x745   : > { %v1141_v5 = vpop.f32.mrf.mxu0 }
 0x746   : > { %v1142_v7 = vadd.f32 %v1942_v4, %v1141_v5 }
 0x747   : > { %v2154_v8 = vpop.f32.mrf.mxu0 }
 0x748   : > { %v1277_v9 = vpack.c.bf16 %v1142_v7, %v1142_v7 }
 0x749   : > { %v1144_v10 = vpop.f32.mrf.mxu0 }
 0x74a   : > { %2175 = vmatmul.mubr.msk.bf16.vlgmr.msra.gmra.mxu1 %vm571_vm2, %v1277_v9  ;;  %v2295_v9 = vld [vmem:[%s2838_s6 + $0x38] sm:$0xff]   ;;  %v2296_v10 = vld [vmem:[%s2838_s6 + $0x30] sm:$0xff]  }
 0x74b   : > { %v2155_v11 = vpop.f32.mrf.mxu0  ;;  %2186 = vmatprep.mubr.msk.bf16.mxu1 %vm2376_vm0, %v2375_v1  ;;  %2185 = vmatpush3.bf16.msra.mxu1 %v1393_v36 }
 0x74c   : > { %2198 = vmatprep.subr.bf16.mxu1 %v2375_v1 }
 0x74d   : > { %v1271_v28 = vpop.f32.mrf.mxu0 }
 0x74e   : > { %v1272_v29 = vadd.f32 %v1960_v27, %v1271_v28 }
 0x74f   : > { %v2170_v30 = vpop.f32.mrf.mxu0 }
 0x750   : > { %v1339_v31 = vpack.c.bf16 %v1272_v29, %v1272_v29  ;;  %v1997_v29 = vld [vmem:[%s2840_s8 + $0xc] sm:$0xf] }
 0x751   : > { %v1274_v32 = vpop.f32.mrf.mxu0  ;;  %v1747_v30 = vsel %vm637_vm4, %v1997_v29, 0 }
 0x752   : > { %v1344_v33 = vsel %vm637_vm4, %v1339_v31, 0 }
 0x753   : > { %v2171_v34 = vpop.f32.mrf.mxu0  ;;  %2179 = vmatpush3.bf16.msra.mxu0 %v1344_v33 }
 0x754   : > { %2190 = vmatprep.subr.bf16.mxu0 %v2375_v1 }
 0x80a   : > { %v1319_v14 = vpop.f32.mrf.mxu1 }
 0x80b   : > { %v1325_v15 = vmul.f32 0.35355338, %v1319_v14 }
 0x80c   : > { %v2176_v16 = vpop.f32.mrf.mxu1 }
 0x80d   : > { %v1326_v17 = vsel %vm619_vm3, -1e+09, %v1325_v15 }
 0x80e   : > { %v1322_v18 = vpop.f32.mrf.mxu1  ;;  %v1327_v19 = vsel %vm571_vm2, %v1326_v17, -inf }
 0x80f   : > { %1328 = vmax.xlane.f32.xlu0 %v1327_v19 }
 0x810   : > { %v2177_v20 = vpop.f32.mrf.mxu1 }
 0x898   : > { %v1329_v21 = vpop.xlane.xlu0 %1328 }
 0x899   : > { %v1330_v22 = vsub.f32 %v1326_v17, %v1329_v21 }
 0x89b   : > { %v1331_v23 = vmul.f32 1.442695, %v1330_v22 }
 0x89d   : > { %2305 = vpow2.f32 %v1331_v23 }
 0x8aa   : > { %v2306_v25 = vpop.eup %2305 }
 0x8ab   : > { %v1333_v26 = vsel %vm571_vm2, %v2306_v25, 0.0 }
 0x8ac   : > { %1334 = vadd.xlane.f32.xlu1 %v1333_v26 }
 0x935   : > { %v1335_v37 = vpop.xlane.xlu1 %1334 }
 0x936   : > { %2307 = vrcp.f32 %v1335_v37 }
 0x943   : > { %v2308_v38 = vpop.eup %2307 }
 0x944   : > { %v1337_v39 = vmul.f32 %v2308_v38, %v2306_v25 }
 0x946   : > { %v1338_v40 = vpack.c.bf16 %v1337_v39, %v1337_v39 }
 0x948   : > { %2181 = vmatmul.mubr.msk.bf16.vlgmr.msra.gmra.mxu0 %vm571_vm2, %v1338_v40 }
 0x949   : > { %2194 = vmatprep.mubr.msk.bf16.mxu0 %vm2376_vm0, %v2375_v1  ;;  %2191 = vmatpush3.bf16.msra.mxu0 %v2292_v41  ;;  %v1999_v41 = vld [vmem:[%s2841_s9] ss:$0 sm:$0xff] }
 0x94a   : > { %2192 = vmatprep.subr.bf16.mxu0 %v2375_v1 }
 0x94d   : > { %2193 = vmatpush3.bf16.msra.mxu0 %v2294_v42 }
 0x94e   : > { %2206 = vmatprep.subr.bf16.mxu0 %v2375_v1 }
 0x950   : > { %2195 = vmatmul.mubr.msk.bf16.vlgmr.msra.gmra.mxu0 %vm399_vm1, %v2513_v6 }
 0x951   : > { %2210 = vmatprep.mubr.msk.bf16.mxu0 %vm2376_vm0, %v2375_v1  ;;  %2207 = vmatpush3.bf16.msra.mxu0 %v2295_v9 }
 0x952   : > { %2208 = vmatprep.subr.bf16.mxu0 %v2375_v1 }
 0x955   : > { %2209 = vmatpush3.bf16.msra.mxu0 %v2296_v10 }
 0x956   : > { %2220 = vmatprep.subr.bf16.mxu0 %v2375_v1 }
 0x958   : > { %2211 = vmatmul.mubr.msk.bf16.vlgmr.msra.gmra.mxu0 %vm399_vm1, %v2513_v6 }
 0x959   : > { %2222 = vmatprep.mubr.msk.bf16.mxu0 %vm2376_vm0, %v2375_v1 }
 0xa08   : > { %v1380_v43 = vpop.f32.mrf.mxu0 }
 0xa09   : > { %v1386_v45 = vpack.c.bf16 %v1380_v43, %v1380_v43 }
 0xa0a   : > { %v2182_v46 = vpop.f32.mrf.mxu0 }
 0xa0b   : > { %2187 = vmatmul.mubr.msk.bf16.vlgmr.msra.gmra.mxu1 %vm571_vm2, %v1386_v45 }
 0xa0c   : > { %v1383_v47 = vpop.f32.mrf.mxu0  ;;  %2199 = vmatpush3.bf16.msra.mxu1 %v2291_v44  ;;  %2202 = vmatprep.mubr.msk.bf16.mxu1 %vm2376_vm0, %v2375_v1 }
 0xa0d   : > { %2200 = vmatprep.subr.bf16.mxu1 %v2375_v1 }
 0xa0e   : > { %v2183_v49 = vpop.f32.mrf.mxu0 }
 0xa10   : > { %2201 = vmatpush3.bf16.msra.mxu1 %v2293_v48  ;;  %v1495_v50 = vpop.f32.mrf.mxu0 }
 0xa11   : > { %2214 = vmatprep.subr.bf16.mxu1 %v2375_v1  ;;  %v1496_v63 = vadd.f32 %v1973_v3, %v1495_v50 }
 0xa12   : > { %v2196_v52 = vpop.f32.mrf.mxu0 }
 0xa13   : > { %2203 = vmatmul.mubr.msk.bf16.vlgmr.msra.gmra.mxu1 %vm399_vm1, %v2513_v6  ;;  %v1631_v8 = vpack.c.bf16 %v1496_v63, %v1496_v63 }
 0xa14   : > { %2216 = vmatprep.mubr.msk.bf16.mxu1 %vm2376_vm0, %v2375_v1  ;;  %v1498_v53 = vpop.f32.mrf.mxu0 }
 0xa16   : > { %v2197_v54 = vpop.f32.mrf.mxu0 }
 0xa18   : > { %v1625_v22 = vpop.f32.mrf.mxu0 }
 0xa1a   : > { %v2212_v23 = vpop.f32.mrf.mxu0 }
 0xa1c   : > { %v1628_v26 = vpop.f32.mrf.mxu0 }
 0xa1e   : > { %v2213_v28 = vpop.f32.mrf.mxu0 }
 0xacb   : > { %v1429_v56 = vpop.f32.mrf.mxu1 }
 0xacc   : > { %v2742_v57 = vadd.f32 %v1429_v56, %v1077_v55 }
 0xacd   : > { %v2188_v58 = vpop.f32.mrf.mxu1 }
 0xacf   : > { %v1432_v59 = vpop.f32.mrf.mxu1 }
 0xad1   : > { %v2189_v60 = vpop.f32.mrf.mxu1 }
 0xad3   : > { %v1560_v62 = vpop.f32.mrf.mxu1 }
 0xad4   : > { %v1561_v0 = vadd.f32 %v1982_v61, %v1560_v62 }
 0xad5   : > { %v2204_v2 = vpop.f32.mrf.mxu1 }
 0xad6   : > { %v1632_v4 = vpack.c.bf16 %v1561_v0, %v1561_v0 }
 0xad7   : > { %v1563_v5 = vpop.f32.mrf.mxu1 }
 0xad8   : > { %v1637_v51 = vsel %vm571_vm2, %v1632_v4, 0 }
 0xad9   : > { %v2205_v7 = vpop.f32.mrf.mxu1  ;;  %2215 = vmatpush3.bf16.xpose.msra.mxu1 %v1637_v51 }
 0xada   : > { %2226 = vmatprep.subr.bf16.mxu1 %v2375_v1 }
 0xae0   : > { %2217 = vmatmul.mubr.msk.bf16.vlgmr.msra.gmra.mxu1 %vm571_vm2, %v1631_v8 }
 0xae1   : > { %2228 = vmatprep.mubr.msk.bf16.mxu1 %vm2376_vm0, %v2375_v1  ;;  %v1991_v1 = vld [vmem:[%s2839_s7 + $0x3] ss:$0 sm:$0xff]  ;;  %2227 = vmatpush3.bf16.msra.mxu1 %v1747_v30 }
 0xae2   : > { %v1626_v24 = vadd.f32 %v1991_v1, %v1625_v22 }
 0xae4   : > { %v1693_v25 = vpack.c.bf16 %v1626_v24, %v1626_v24 }
 0xae6   : > { %v1698_v27 = vsel %vm637_vm4, %v1693_v25, 0 }
 0xae7   : > { %2221 = vmatpush3.bf16.msra.mxu0 %v1698_v27 }
 0xba0   : > { %v1673_v11 = vpop.f32.mrf.mxu1 }
 0xba1   : > { %v1679_v12 = vmul.f32 0.35355338, %v1673_v11 }
 0xba2   : > { %v2218_v13 = vpop.f32.mrf.mxu1 }
 0xba3   : > { %v1680_v14 = vsel %vm619_vm3, -1e+09, %v1679_v12 }
 0xba4   : > { %v1676_v15 = vpop.f32.mrf.mxu1  ;;  %v1681_v16 = vsel %vm571_vm2, %v1680_v14, -inf }
 0xba5   : > { %1682 = vmax.xlane.f32.xlu0 %v1681_v16 }
 0xba6   : > { %v2219_v17 = vpop.f32.mrf.mxu1 }
 0xc2e   : > { %v1683_v18 = vpop.xlane.xlu0 %1682 }
 0xc2f   : > { %v1684_v19 = vsub.f32 %v1680_v14, %v1683_v18 }
 0xc31   : > { %v1685_v20 = vmul.f32 1.442695, %v1684_v19 }
 0xc33   : > { %2309 = vpow2.f32 %v1685_v20 }
 0xc40   : > { %v2310_v21 = vpop.eup %2309 }
 0xc41   : > { %v1687_v6 = vsel %vm571_vm2, %v2310_v21, 0.0 }
 0xc42   : > { %1688 = vadd.xlane.f32.xlu1 %v1687_v6 }
 0xccb   : > { %v1689_v31 = vpop.xlane.xlu1 %1688 }
 0xccc   : > { %2311 = vrcp.f32 %v1689_v31 }
 0xcd9   : > { %v2312_v32 = vpop.eup %2311 }
 0xcda   : > { %v1691_v33 = vmul.f32 %v2312_v32, %v2310_v21 }
 0xcdc   : > { %v1692_v34 = vpack.c.bf16 %v1691_v33, %v1691_v33 }
 0xcde   : > { %2223 = vmatmul.mubr.msk.bf16.vlgmr.msra.gmra.mxu0 %vm571_vm2, %v1692_v34 }
 0xd9e   : > { %v1734_v35 = vpop.f32.mrf.mxu0 }
 0xd9f   : > { %v1740_v36 = vpack.c.bf16 %v1734_v35, %v1734_v35 }
 0xda0   : > { %v2224_v37 = vpop.f32.mrf.mxu0 }
 0xda1   : > { %2229 = vmatmul.mubr.msk.bf16.vlgmr.msra.gmra.mxu1 %vm571_vm2, %v1740_v36 }
 0xda2   : > { %v1737_v38 = vpop.f32.mrf.mxu0 }
 0xda4   : > { %v2225_v39 = vpop.f32.mrf.mxu0 }
 0xe61   : > { %v1783_v40 = vpop.f32.mrf.mxu1 }
 0xe62   : > { %v1789_v42 = vadd.f32 %v1783_v40, %v2742_v57 }
 0xe63   : > { %v2230_v43 = vpop.f32.mrf.mxu1 }
 0xe64   : > { %v1797_v44 = vadd.f32 %v1999_v41, %v1789_v42 }
 0xe65   : > { %v1786_v45 = vpop.f32.mrf.mxu1 }
 0xe66   : > { %1798 = vst.msk [vmem:[%s363_s30] sm:$0xff] %vm399_vm1, %v1797_v44 }
 0xe67   : > { %v2231_v46 = vpop.f32.mrf.mxu1 }
 0xe68   : > { %2326 = shalt.err (!%p2323_p3)
}
 0xe69   : > { %s2327_s29 = scalar_lea.hbm %s2790_s25, 128  ;;  %s2331_s12 = scalar_lea.hbm %s2842_s10, 256 }
 0xe6a   : > { %p2328_p4 = scmp.ne.s32.totalorder %s2790_s25, %s2327_s29  ;;  %p2332_p9 = scmp.lt.s32.totalorder %s2790_s25, %s2842_s10 }
 0xe6b   : > { %p2333_p10 = scmp.lt.s32.totalorder %s2331_s12, %s2327_s29 }
 0xe6c   : > { %p2329_p7 = pnand %p2328_p4, %p2471_p5 }
 0xe6d   : > { %p2334_p11 = por %p2333_p10, %p2332_p9 }
 0xe6e   : > { %p2330_p8 = pneg %p2329_p7 }
 0xe70   : > { %p2335_p12 = pnand %p2334_p11, %p2330_p8 }
 0xe72   : > { %2338 = shalt.err (!%p2335_p12)
}
 0xe73   : > { %2232 = dma.vmem_to_hbm [thread:$0]  (%p2471_p5), %s2792_s11, 128, %s2790_s25, %s1800_s17  }
 0xe74 PF: > { %p2238_p13 = scmp.ge.s32.totalorder %s2373_s16, 2  ;;  %s1825_s26 = sand.u32 1, %s2361_s13  }
 0xe75   : > { %s1826_s18 = scalar_lea.sflag [#allocation3], %s1825_s26 }
 0xe76   : > { %p2235_p0 = pnand %p2238_p13, %p2475_p6 }
 0xe78   : > { %p2236_p1 = pneg %p2235_p0 }
 0xe7a   : > { %2356 = dma.done.wait (%p2236_p1), %s1826_s18, 128  }
 0xe7b   : > { %2358 = vsyncadd (%p2236_p1), %s1826_s18, 4294967168  ;;  %p20_p2 = scmp.ge.s32.totalorder %s2458_s19, 4   ;;  %s2845_s13 = smov %s2365_s14 }
 0xe7c   : > { %s2846_s14 = smov %s2369_s15  ;;  %s2847_s15 = smov %s2469_s22 }
 0xe7d   : > { %s2848_s16 = smov %s2458_s19  ;;  %22 = sbr.rel (!%p20_p2) target bundleno = 3 (0x3), region = 119 }
 0xe82   :  { %1831 = vsyncpa [#allocation3], 1 }
 0xe83   :  { %1833 = vsyncpa [#allocation3 + $0x1], 1 }

</bundles_post_ra>
